<compile_context>
chip_gen: v7x
topology: tpu7x:2x2x1
jax: 0.10.0
libtpu: 0.0.40
codegen_flags: <defaults>
</compile_context>

<pallas_src>
import functools

import jax
import jax.numpy as jnp
from jax import lax
from jax.experimental import pallas as pl
from jax.experimental.pallas import tpu as pltpu


# For output parity p (0/1) along one spatial axis, the 2 contributing input taps sit
# at padded-coordinate offsets _TAP_OFF[p] and use ConvTranspose kernel indices
# _TAP_K[p] (derived from oh = 2*i - 1 + kh, 0 <= kh < 4).
_TAP_OFF = ((0, 1), (1, 2))
_TAP_K = ((3, 1), (2, 0))


def _conv_groups():
    """Group the 16 (parity, tap) contributions by their distinct input shift offset.

    Returns a tuple of (dh, dw, parities, k_indices) where
      dh, dw     : shift of the x slice inside the padded/flattened input,
      parities   : tuple of flat parity ids (2*ph + pw) fed by this offset,
      k_indices  : matching tuple of (kh, kw) ConvTranspose kernel indices.
    9 groups total: 1 of size 4, 4 of size 2, 4 of size 1 (sum = 16).
    """
    groups = {}
    for ph in range(2):
        for pw in range(2):
            for a in range(2):
                for b in range(2):
                    off = (_TAP_OFF[ph][a], _TAP_OFF[pw][b])
                    groups.setdefault(off, []).append(
                        (2 * ph + pw, (_TAP_K[ph][a], _TAP_K[pw][b])))
    out = []
    for off in sorted(groups):
        entries = groups[off]
        out.append((off[0], off[1],
                    tuple(e[0] for e in entries),
                    tuple(e[1] for e in entries)))
    return tuple(out)


_GROUPS = _conv_groups()


def _unet_up_kernel(x_ref, w_ref, m_ref, o_ref, *, H, W, eps):
    """Fused ConvTranspose2d(4,2,1) + InstanceNorm2d + ReLU for one (instance, Cout-tile).

    x_ref : (1, (H+3)*(W+2), Cin)   f32  zero-padded, spatially flattened, channels-last
    w_ref : (Cin, 16*TCO)           bf16 per-Cout-tile packing of the 16 tap matrices,
                                         ordered group-major following _GROUPS
    m_ref : (H*(W+2), 1)            f32  1.0 on the W valid columns of each padded row
    o_ref : (1, 2, 2, H*(W+2), TCO) f32  normalized + ReLU'd output, parity-major, padded cols
    """
    L = W + 2
    M = H * L
    tco = o_ref.shape[-1]
    mask = m_ref[...]                                   # (M, 1)

    # ---- transposed conv: 9 grouped shift-dots, f32 accumulation per parity --------
    accs = [jnp.zeros((M, tco), jnp.float32) for _ in range(4)]
    col = 0
    for (dh, dw, parities, _) in _GROUPS:
        start = dh * L + dw
        xs = x_ref[0, start:start + M, :].astype(jnp.bfloat16)        # (M, Cin)
        cnt = len(parities)
        wg = w_ref[:, col * tco:(col + cnt) * tco]                    # (Cin, cnt*tco)
        res = jnp.dot(xs, wg, preferred_element_type=jnp.float32)     # (M, cnt*tco)
        for i, p in enumerate(parities):
            accs[p] = accs[p] + res[:, i * tco:(i + 1) * tco]
        col += cnt

    # ---- one-pass InstanceNorm stats over the 4*H*W real pixels (pad cols masked) ---
    s1 = jnp.zeros((1, tco), jnp.float32)               # per-channel sum
    s2 = jnp.zeros((1, tco), jnp.float32)               # per-channel sum of squares
    for p in range(4):
        am = accs[p] * mask                             # zero out the 2 pad columns/row
        s1 = s1 + jnp.sum(am, axis=0, keepdims=True)
        s2 = s2 + jnp.sum(accs[p] * am, axis=0, keepdims=True)

    inv_n = 1.0 / float(4 * H * W)
    mean = s1 * inv_n
    var = jnp.maximum(s2 * inv_n - mean * mean, 0.0)     # biased var (InstanceNorm2d default)
    scale = lax.rsqrt(var + eps)

    # ---- normalize + ReLU, store per parity -----------------------------------------
    for p in range(4):
        ph, pw = p // 2, p % 2
        o_ref[0, ph, pw] = jnp.maximum((accs[p] - mean) * scale, 0.0)


def unet_up_forward(x_nchw, skip_nchw, weight, eps=1e-5):
    """UNetUp.forward: relu(instance_norm(conv_transpose2d(x, weight))) ++ skip (channel dim).

    x_nchw: (N, Cin, H, W), skip_nchw: (N, Cskip, 2H, 2W), weight: (Cin, Cout, 4, 4).
    """
    N, Cin, H, W = x_nchw.shape
    Cin_w, Cout, KH, KW = weight.shape
    assert Cin_w == Cin and (KH, KW) == (4, 4)
    OH, OW = 2 * H, 2 * W
    Ns, Cskip, Hs, Ws = skip_nchw.shape
    assert (Ns, Hs, Ws) == (N, OH, OW)

    L = W + 2               # padded row length (1 left + 1 right zero column)
    M = H * L               # rows of the per-parity "extended" output (keeps 2 pad cols)

    # -- output-channel tiling (keeps the lane dim a full dim or a multiple of 128) ------
    if Cout > 256 and Cout % 256 == 0:
        tco = 256
    elif Cout > 128 and Cout % 128 == 0:
        tco = 128
    else:
        tco = Cout
    n_co = Cout // tco

    # -- weights, bf16, packed group-major per Cout tile: (Cin, n_co * 16 * tco) ---------
    wt = jnp.transpose(weight, (2, 3, 0, 1)).astype(jnp.bfloat16)   # (4, 4, Cin, Cout)
    mats = []
    for (_, _, _, kidx) in _GROUPS:
        for (kh, kw) in kidx:
            mats.append(wt[kh, kw])                                 # (Cin, Cout)
    w_stack = jnp.stack(mats, axis=0)                               # (16, Cin, Cout)
    w_packed = (jnp.transpose(w_stack, (1, 0, 2))                   # (Cin, 16, Cout)
                .reshape(Cin, 16, n_co, tco)
                .transpose(0, 2, 1, 3)                              # (Cin, n_co, 16, tco)
                .reshape(Cin, n_co * 16 * tco))

    # -- x: NCHW -> channels-last, zero-padded (1 top, 2 bottom, 1 left, 1 right),
    #      spatially flattened so every conv tap is a contiguous (M, Cin) slice -----------
    x_nhwc = jnp.transpose(x_nchw, (0, 2, 3, 1)).astype(jnp.float32)
    x_pad = jnp.pad(x_nhwc, ((0, 0), (1, 2), (1, 1), (0, 0)))
    x_flat = x_pad.reshape(N, (H + 3) * L, Cin)

    # -- validity mask for the 2 pad columns carried through the extended output ---------
    col = lax.broadcasted_iota(jnp.int32, (H, L), 1)
    mask = (col < W).astype(jnp.float32).reshape(M, 1)

    y_ext = pl.pallas_call(
        functools.partial(_unet_up_kernel, H=H, W=W, eps=eps),
        out_shape=jax.ShapeDtypeStruct((N, 2, 2, M, Cout), jnp.float32),
        grid=(N, n_co),
        in_specs=[
            pl.BlockSpec((1, (H + 3) * L, Cin), lambda n, c: (n, 0, 0)),
            pl.BlockSpec((Cin, 16 * tco), lambda n, c: (0, c)),
            pl.BlockSpec((M, 1), lambda n, c: (0, 0)),
        ],
        out_specs=pl.BlockSpec((1, 2, 2, M, tco), lambda n, c: (n, 0, 0, 0, c)),
        compiler_params=pltpu.CompilerParams(
            dimension_semantics=("parallel", "parallel"),
            vmem_limit_bytes=48 * 1024 * 1024,
        ),
    )(x_flat, w_packed, mask)

    # -- one XLA layout pass: drop pad columns, interleave the 4 sub-pixel grids,
    #    and land directly in NCHW --------------------------------------------------------
    y6 = y_ext.reshape(N, 2, 2, H, L, Cout)[:, :, :, :, :W, :]      # (N, ph, pw, H, W, C)
    y_nchw = jnp.transpose(y6, (0, 5, 3, 1, 4, 2)).reshape(N, Cout, OH, OW)

    # -- skip never enters the kernel: pure channel concat at the XLA level --------------
    return jnp.concatenate([y_nchw, skip_nchw.astype(y_nchw.dtype)], axis=1)


def _reference(x, skip, w, eps=1e-5):
    """Plain-JAX reference: ConvTranspose2d(4,2,1,bias=False) + InstanceNorm2d + ReLU + concat."""
    N, Cin, H, W = x.shape
    Cout = w.shape[1]
    contrib = jnp.einsum("ncij,cdkl->ndijkl", x, w)                 # (N, Cout, H, W, 4, 4)
    full = jnp.zeros((N, Cout, 2 * H + 2, 2 * W + 2), jnp.float32)
    for kh in range(4):
        for kw in range(4):
            full = full.at[:, :, kh:kh + 2 * H:2, kw:kw + 2 * W:2].add(contrib[..., kh, kw])
    y = full[:, :, 1:1 + 2 * H, 1:1 + 2 * W]                        # remove padding=1 border
    mean = y.mean(axis=(2, 3), keepdims=True)
    var = ((y - mean) ** 2).mean(axis=(2, 3), keepdims=True)
    y = jnp.maximum((y - mean) * lax.rsqrt(var + eps), 0.0)
    return jnp.concatenate([y, skip], axis=1)


if __name__ == "__main__":
    # Small shapes consistent with UNetUp: in_channels=8, out_channels=4,
    # skip carries out_channels channels at 2x spatial resolution.
    N, Cin, H, W = 2, 8, 8, 8
    Cout = 4
    key = jax.random.PRNGKey(0)
    k_w, k_x, k_s = jax.random.split(key, 3)
    weight = jax.random.normal(k_w, (Cin, Cout, 4, 4), jnp.float32) * 0.1
    x = jax.random.normal(k_x, (N, Cin, H, W), jnp.float32)
    skip = jax.random.normal(k_s, (N, Cout, 2 * H, 2 * W), jnp.float32)

    out = jax.jit(unet_up_forward)(x, skip, weight)
    out = jax.block_until_ready(out)
    assert out.shape == (N, 2 * Cout, 2 * H, 2 * W), out.shape
    assert out.dtype == jnp.float32

    ref = _reference(x, skip, weight)
    err = float(jnp.max(jnp.abs(out - ref)))
    assert err < 5e-2, f"max abs error vs reference: {err}"
    print("KERNEL_OK")
</pallas_src>

<mosaic_0001>
module attributes {stable_mosaic.version = 11 : i64} {
  func.func @_unet_up_kernel(%arg0: i32, %arg1: i32, %arg2: memref<1x110x8xf32, #tpu.memory_space<vmem>>, %arg3: memref<8x64xbf16, #tpu.memory_space<vmem>>, %arg4: memref<80x1xf32, #tpu.memory_space<vmem>>, %arg5: memref<1x2x2x80x4xf32, #tpu.memory_space<vmem>>) attributes {dimension_semantics = [#tpu.dimension_semantics<parallel>, #tpu.dimension_semantics<parallel>], iteration_bounds = array<i64: 2, 1>, scalar_prefetch = 0 : i64, scratch_operands = 0 : i64, tpu.core_type = #tpu.core_type<tc>, window_params = [{transform_indices = @transform_0, window_bounds = array<i64: 1, 110, 8>}, {transform_indices = @transform_1, window_bounds = array<i64: 8, 64>}, {pipeline_mode = #tpu.pipeline_mode<synchronous>, transform_indices = @transform_2, window_bounds = array<i64: 80, 1>}, {transform_indices = @transform_3, window_bounds = array<i64: 1, 2, 2, 80, 4>}]} {
    %c0 = arith.constant 0 : index
    %c0_0 = arith.constant 0 : index
    %0 = vector.load %arg4[%c0, %c0_0] : memref<80x1xf32, #tpu.memory_space<vmem>>, vector<80x1xf32>
    %cst = arith.constant 0.000000e+00 : f32
    %1 = vector.broadcast %cst : f32 to vector<80x4xf32>
    %cst_1 = arith.constant 0.000000e+00 : f32
    %2 = vector.broadcast %cst_1 : f32 to vector<80x4xf32>
    %cst_2 = arith.constant 0.000000e+00 : f32
    %3 = vector.broadcast %cst_2 : f32 to vector<80x4xf32>
    %cst_3 = arith.constant 0.000000e+00 : f32
    %4 = vector.broadcast %cst_3 : f32 to vector<80x4xf32>
    %c0_4 = arith.constant 0 : index
    %c0_5 = arith.constant 0 : index
    %c0_6 = arith.constant 0 : index
    %5 = vector.load %arg2[%c0_4, %c0_5, %c0_6] : memref<1x110x8xf32, #tpu.memory_space<vmem>>, vector<1x80x8xf32>
    %6 = vector.shape_cast %5 : vector<1x80x8xf32> to vector<80x8xf32>
    %7 = arith.truncf %6 : vector<80x8xf32> to vector<80x8xbf16>
    %c0_7 = arith.constant 0 : index
    %c0_8 = arith.constant 0 : index
    %8 = vector.load %arg3[%c0_7, %c0_8] : memref<8x64xbf16, #tpu.memory_space<vmem>>, vector<8x4xbf16>
    %cst_9 = arith.constant dense<0.000000e+00> : vector<80x4xf32>
    %9 = tpu.matmul %7, %8, %cst_9 {dimension_numbers = #tpu.dot_dimension_numbers<[1], [0], [0], [1], [0, 0, 1, 1], [], []>} : vector<80x8xbf16>, vector<8x4xbf16>, vector<80x4xf32> -> vector<80x4xf32>
    %10 = arith.addf %1, %9 : vector<80x4xf32>
    %c0_10 = arith.constant 0 : index
    %c1 = arith.constant 1 : index
    %c0_11 = arith.constant 0 : index
    %11 = vector.load %arg2[%c0_10, %c1, %c0_11] : memref<1x110x8xf32, #tpu.memory_space<vmem>>, vector<1x80x8xf32>
    %12 = vector.shape_cast %11 : vector<1x80x8xf32> to vector<80x8xf32>
    %13 = arith.truncf %12 : vector<80x8xf32> to vector<80x8xbf16>
    %c0_12 = arith.constant 0 : index
    %c4 = arith.constant 4 : index
    %14 = vector.load %arg3[%c0_12, %c4] : memref<8x64xbf16, #tpu.memory_space<vmem>>, vector<8x8xbf16>
    %cst_13 = arith.constant dense<0.000000e+00> : vector<80x8xf32>
    %15 = tpu.matmul %13, %14, %cst_13 {dimension_numbers = #tpu.dot_dimension_numbers<[1], [0], [0], [1], [0, 0, 1, 1], [], []>} : vector<80x8xbf16>, vector<8x8xbf16>, vector<80x8xf32> -> vector<80x8xf32>
    %16 = vector.extract_strided_slice %15 {offsets = [0, 0], sizes = [80, 4], strides = [1, 1]} : vector<80x8xf32> to vector<80x4xf32>
    %17 = arith.addf %10, %16 : vector<80x4xf32>
    %18 = vector.extract_strided_slice %15 {offsets = [0, 4], sizes = [80, 4], strides = [1, 1]} : vector<80x8xf32> to vector<80x4xf32>
    %19 = arith.addf %2, %18 : vector<80x4xf32>
    %c0_14 = arith.constant 0 : index
    %c2 = arith.constant 2 : index
    %c0_15 = arith.constant 0 : index
    %20 = vector.load %arg2[%c0_14, %c2, %c0_15] : memref<1x110x8xf32, #tpu.memory_space<vmem>>, vector<1x80x8xf32>
    %21 = vector.shape_cast %20 : vector<1x80x8xf32> to vector<80x8xf32>
    %22 = arith.truncf %21 : vector<80x8xf32> to vector<80x8xbf16>
    %c0_16 = arith.constant 0 : index
    %c12 = arith.constant 12 : index
    %23 = vector.load %arg3[%c0_16, %c12] : memref<8x64xbf16, #tpu.memory_space<vmem>>, vector<8x4xbf16>
    %cst_17 = arith.constant dense<0.000000e+00> : vector<80x4xf32>
    %24 = tpu.matmul %22, %23, %cst_17 {dimension_numbers = #tpu.dot_dimension_numbers<[1], [0], [0], [1], [0, 0, 1, 1], [], []>} : vector<80x8xbf16>, vector<8x4xbf16>, vector<80x4xf32> -> vector<80x4xf32>
    %25 = arith.addf %19, %24 : vector<80x4xf32>
    %c0_18 = arith.constant 0 : index
    %c10 = arith.constant 10 : index
    %c0_19 = arith.constant 0 : index
    %26 = vector.load %arg2[%c0_18, %c10, %c0_19] : memref<1x110x8xf32, #tpu.memory_space<vmem>>, vector<1x80x8xf32>
    %27 = vector.shape_cast %26 : vector<1x80x8xf32> to vector<80x8xf32>
    %28 = arith.truncf %27 : vector<80x8xf32> to vector<80x8xbf16>
    %c0_20 = arith.constant 0 : index
    %c16 = arith.constant 16 : index
    %29 = vector.load %arg3[%c0_20, %c16] : memref<8x64xbf16, #tpu.memory_space<vmem>>, vector<8x8xbf16>
    %cst_21 = arith.constant dense<0.000000e+00> : vector<80x8xf32>
    %30 = tpu.matmul %28, %29, %cst_21 {dimension_numbers = #tpu.dot_dimension_numbers<[1], [0], [0], [1], [0, 0, 1, 1], [], []>} : vector<80x8xbf16>, vector<8x8xbf16>, vector<80x8xf32> -> vector<80x8xf32>
    %31 = vector.extract_strided_slice %30 {offsets = [0, 0], sizes = [80, 4], strides = [1, 1]} : vector<80x8xf32> to vector<80x4xf32>
    %32 = arith.addf %17, %31 : vector<80x4xf32>
    %33 = vector.extract_strided_slice %30 {offsets = [0, 4], sizes = [80, 4], strides = [1, 1]} : vector<80x8xf32> to vector<80x4xf32>
    %34 = arith.addf %3, %33 : vector<80x4xf32>
    %c0_22 = arith.constant 0 : index
    %c11 = arith.constant 11 : index
    %c0_23 = arith.constant 0 : index
    %35 = vector.load %arg2[%c0_22, %c11, %c0_23] : memref<1x110x8xf32, #tpu.memory_space<vmem>>, vector<1x80x8xf32>
    %36 = vector.shape_cast %35 : vector<1x80x8xf32> to vector<80x8xf32>
    %37 = arith.truncf %36 : vector<80x8xf32> to vector<80x8xbf16>
    %c0_24 = arith.constant 0 : index
    %c24 = arith.constant 24 : index
    %38 = vector.load %arg3[%c0_24, %c24] : memref<8x64xbf16, #tpu.memory_space<vmem>>, vector<8x16xbf16>
    %cst_25 = arith.constant dense<0.000000e+00> : vector<80x16xf32>
    %39 = tpu.matmul %37, %38, %cst_25 {dimension_numbers = #tpu.dot_dimension_numbers<[1], [0], [0], [1], [0, 0, 1, 1], [], []>} : vector<80x8xbf16>, vector<8x16xbf16>, vector<80x16xf32> -> vector<80x16xf32>
    %40 = vector.extract_strided_slice %39 {offsets = [0, 0], sizes = [80, 4], strides = [1, 1]} : vector<80x16xf32> to vector<80x4xf32>
    %41 = arith.addf %32, %40 : vector<80x4xf32>
    %42 = vector.extract_strided_slice %39 {offsets = [0, 4], sizes = [80, 4], strides = [1, 1]} : vector<80x16xf32> to vector<80x4xf32>
    %43 = arith.addf %25, %42 : vector<80x4xf32>
    %44 = vector.extract_strided_slice %39 {offsets = [0, 8], sizes = [80, 4], strides = [1, 1]} : vector<80x16xf32> to vector<80x4xf32>
    %45 = arith.addf %34, %44 : vector<80x4xf32>
    %46 = vector.extract_strided_slice %39 {offsets = [0, 12], sizes = [80, 4], strides = [1, 1]} : vector<80x16xf32> to vector<80x4xf32>
    %47 = arith.addf %4, %46 : vector<80x4xf32>
    %c0_26 = arith.constant 0 : index
    %c12_27 = arith.constant 12 : index
    %c0_28 = arith.constant 0 : index
    %48 = vector.load %arg2[%c0_26, %c12_27, %c0_28] : memref<1x110x8xf32, #tpu.memory_space<vmem>>, vector<1x80x8xf32>
    %49 = vector.shape_cast %48 : vector<1x80x8xf32> to vector<80x8xf32>
    %50 = arith.truncf %49 : vector<80x8xf32> to vector<80x8xbf16>
    %c0_29 = arith.constant 0 : index
    %c40 = arith.constant 40 : index
    %51 = vector.load %arg3[%c0_29, %c40] : memref<8x64xbf16, #tpu.memory_space<vmem>>, vector<8x8xbf16>
    %cst_30 = arith.constant dense<0.000000e+00> : vector<80x8xf32>
    %52 = tpu.matmul %50, %51, %cst_30 {dimension_numbers = #tpu.dot_dimension_numbers<[1], [0], [0], [1], [0, 0, 1, 1], [], []>} : vector<80x8xbf16>, vector<8x8xbf16>, vector<80x8xf32> -> vector<80x8xf32>
    %53 = vector.extract_strided_slice %52 {offsets = [0, 0], sizes = [80, 4], strides = [1, 1]} : vector<80x8xf32> to vector<80x4xf32>
    %54 = arith.addf %43, %53 : vector<80x4xf32>
    %55 = vector.extract_strided_slice %52 {offsets = [0, 4], sizes = [80, 4], strides = [1, 1]} : vector<80x8xf32> to vector<80x4xf32>
    %56 = arith.addf %47, %55 : vector<80x4xf32>
    %c0_31 = arith.constant 0 : index
    %c20 = arith.constant 20 : index
    %c0_32 = arith.constant 0 : index
    %57 = vector.load %arg2[%c0_31, %c20, %c0_32] : memref<1x110x8xf32, #tpu.memory_space<vmem>>, vector<1x80x8xf32>
    %58 = vector.shape_cast %57 : vector<1x80x8xf32> to vector<80x8xf32>
    %59 = arith.truncf %58 : vector<80x8xf32> to vector<80x8xbf16>
    %c0_33 = arith.constant 0 : index
    %c48 = arith.constant 48 : index
    %60 = vector.load %arg3[%c0_33, %c48] : memref<8x64xbf16, #tpu.memory_space<vmem>>, vector<8x4xbf16>
    %cst_34 = arith.constant dense<0.000000e+00> : vector<80x4xf32>
    %61 = tpu.matmul %59, %60, %cst_34 {dimension_numbers = #tpu.dot_dimension_numbers<[1], [0], [0], [1], [0, 0, 1, 1], [], []>} : vector<80x8xbf16>, vector<8x4xbf16>, vector<80x4xf32> -> vector<80x4xf32>
    %62 = arith.addf %45, %61 : vector<80x4xf32>
    %c0_35 = arith.constant 0 : index
    %c21 = arith.constant 21 : index
    %c0_36 = arith.constant 0 : index
    %63 = vector.load %arg2[%c0_35, %c21, %c0_36] : memref<1x110x8xf32, #tpu.memory_space<vmem>>, vector<1x80x8xf32>
    %64 = vector.shape_cast %63 : vector<1x80x8xf32> to vector<80x8xf32>
    %65 = arith.truncf %64 : vector<80x8xf32> to vector<80x8xbf16>
    %c0_37 = arith.constant 0 : index
    %c52 = arith.constant 52 : index
    %66 = vector.load %arg3[%c0_37, %c52] : memref<8x64xbf16, #tpu.memory_space<vmem>>, vector<8x8xbf16>
    %cst_38 = arith.constant dense<0.000000e+00> : vector<80x8xf32>
    %67 = tpu.matmul %65, %66, %cst_38 {dimension_numbers = #tpu.dot_dimension_numbers<[1], [0], [0], [1], [0, 0, 1, 1], [], []>} : vector<80x8xbf16>, vector<8x8xbf16>, vector<80x8xf32> -> vector<80x8xf32>
    %68 = vector.extract_strided_slice %67 {offsets = [0, 0], sizes = [80, 4], strides = [1, 1]} : vector<80x8xf32> to vector<80x4xf32>
    %69 = arith.addf %62, %68 : vector<80x4xf32>
    %70 = vector.extract_strided_slice %67 {offsets = [0, 4], sizes = [80, 4], strides = [1, 1]} : vector<80x8xf32> to vector<80x4xf32>
    %71 = arith.addf %56, %70 : vector<80x4xf32>
    %c0_39 = arith.constant 0 : index
    %c22 = arith.constant 22 : index
    %c0_40 = arith.constant 0 : index
    %72 = vector.load %arg2[%c0_39, %c22, %c0_40] : memref<1x110x8xf32, #tpu.memory_space<vmem>>, vector<1x80x8xf32>
    %73 = vector.shape_cast %72 : vector<1x80x8xf32> to vector<80x8xf32>
    %74 = arith.truncf %73 : vector<80x8xf32> to vector<80x8xbf16>
    %c0_41 = arith.constant 0 : index
    %c60 = arith.constant 60 : index
    %75 = vector.load %arg3[%c0_41, %c60] : memref<8x64xbf16, #tpu.memory_space<vmem>>, vector<8x4xbf16>
    %cst_42 = arith.constant dense<0.000000e+00> : vector<80x4xf32>
    %76 = tpu.matmul %74, %75, %cst_42 {dimension_numbers = #tpu.dot_dimension_numbers<[1], [0], [0], [1], [0, 0, 1, 1], [], []>} : vector<80x8xbf16>, vector<8x4xbf16>, vector<80x4xf32> -> vector<80x4xf32>
    %77 = arith.addf %71, %76 : vector<80x4xf32>
    %cst_43 = arith.constant 0.000000e+00 : f32
    %78 = vector.broadcast %cst_43 : f32 to vector<1x4xf32>
    %cst_44 = arith.constant 0.000000e+00 : f32
    %79 = vector.broadcast %cst_44 : f32 to vector<1x4xf32>
    %80 = vector.broadcast %0 : vector<80x1xf32> to vector<80x4xf32>
    %81 = arith.mulf %41, %80 : vector<80x4xf32>
    %cst_45 = arith.constant dense<0.000000e+00> : vector<4xf32>
    %82 = vector.multi_reduction <add>, %81, %cst_45 [0] : vector<80x4xf32> to vector<4xf32>
    %83 = vector.shape_cast %82 : vector<4xf32> to vector<1x4xf32>
    %84 = arith.addf %78, %83 : vector<1x4xf32>
    %85 = arith.mulf %41, %81 : vector<80x4xf32>
    %cst_46 = arith.constant dense<0.000000e+00> : vector<4xf32>
    %86 = vector.multi_reduction <add>, %85, %cst_46 [0] : vector<80x4xf32> to vector<4xf32>
    %87 = vector.shape_cast %86 : vector<4xf32> to vector<1x4xf32>
    %88 = arith.addf %79, %87 : vector<1x4xf32>
    %89 = vector.broadcast %0 : vector<80x1xf32> to vector<80x4xf32>
    %90 = arith.mulf %54, %89 : vector<80x4xf32>
    %cst_47 = arith.constant dense<0.000000e+00> : vector<4xf32>
    %91 = vector.multi_reduction <add>, %90, %cst_47 [0] : vector<80x4xf32> to vector<4xf32>
    %92 = vector.shape_cast %91 : vector<4xf32> to vector<1x4xf32>
    %93 = arith.addf %84, %92 : vector<1x4xf32>
    %94 = arith.mulf %54, %90 : vector<80x4xf32>
    %cst_48 = arith.constant dense<0.000000e+00> : vector<4xf32>
    %95 = vector.multi_reduction <add>, %94, %cst_48 [0] : vector<80x4xf32> to vector<4xf32>
    %96 = vector.shape_cast %95 : vector<4xf32> to vector<1x4xf32>
    %97 = arith.addf %88, %96 : vector<1x4xf32>
    %98 = vector.broadcast %0 : vector<80x1xf32> to vector<80x4xf32>
    %99 = arith.mulf %69, %98 : vector<80x4xf32>
    %cst_49 = arith.constant dense<0.000000e+00> : vector<4xf32>
    %100 = vector.multi_reduction <add>, %99, %cst_49 [0] : vector<80x4xf32> to vector<4xf32>
    %101 = vector.shape_cast %100 : vector<4xf32> to vector<1x4xf32>
    %102 = arith.addf %93, %101 : vector<1x4xf32>
    %103 = arith.mulf %69, %99 : vector<80x4xf32>
    %cst_50 = arith.constant dense<0.000000e+00> : vector<4xf32>
    %104 = vector.multi_reduction <add>, %103, %cst_50 [0] : vector<80x4xf32> to vector<4xf32>
    %105 = vector.shape_cast %104 : vector<4xf32> to vector<1x4xf32>
    %106 = arith.addf %97, %105 : vector<1x4xf32>
    %107 = vector.broadcast %0 : vector<80x1xf32> to vector<80x4xf32>
    %108 = arith.mulf %77, %107 : vector<80x4xf32>
    %cst_51 = arith.constant dense<0.000000e+00> : vector<4xf32>
    %109 = vector.multi_reduction <add>, %108, %cst_51 [0] : vector<80x4xf32> to vector<4xf32>
    %110 = vector.shape_cast %109 : vector<4xf32> to vector<1x4xf32>
    %111 = arith.addf %102, %110 : vector<1x4xf32>
    %112 = arith.mulf %77, %108 : vector<80x4xf32>
    %cst_52 = arith.constant dense<0.000000e+00> : vector<4xf32>
    %113 = vector.multi_reduction <add>, %112, %cst_52 [0] : vector<80x4xf32> to vector<4xf32>
    %114 = vector.shape_cast %113 : vector<4xf32> to vector<1x4xf32>
    %115 = arith.addf %106, %114 : vector<1x4xf32>
    %cst_53 = arith.constant 3.906250e-03 : f32
    %116 = vector.broadcast %cst_53 : f32 to vector<1x4xf32>
    %117 = arith.mulf %111, %116 : vector<1x4xf32>
    %cst_54 = arith.constant 3.906250e-03 : f32
    %118 = vector.broadcast %cst_54 : f32 to vector<1x4xf32>
    %119 = arith.mulf %115, %118 : vector<1x4xf32>
    %120 = arith.mulf %117, %117 : vector<1x4xf32>
    %121 = arith.subf %119, %120 : vector<1x4xf32>
    %cst_55 = arith.constant 0.000000e+00 : f32
    %122 = vector.broadcast %cst_55 : f32 to vector<1x4xf32>
    %123 = arith.maximumf %121, %122 : vector<1x4xf32>
    %cst_56 = arith.constant 9.99999974E-6 : f32
    %124 = vector.broadcast %cst_56 : f32 to vector<1x4xf32>
    %125 = arith.addf %123, %124 : vector<1x4xf32>
    %126 = math.rsqrt %125 : vector<1x4xf32>
    %127 = vector.broadcast %117 : vector<1x4xf32> to vector<80x4xf32>
    %128 = arith.subf %41, %127 : vector<80x4xf32>
    %129 = vector.broadcast %126 : vector<1x4xf32> to vector<80x4xf32>
    %130 = arith.mulf %128, %129 : vector<80x4xf32>
    %cst_57 = arith.constant 0.000000e+00 : f32
    %131 = vector.broadcast %cst_57 : f32 to vector<80x4xf32>
    %132 = arith.maximumf %130, %131 : vector<80x4xf32>
    %c0_58 = arith.constant 0 : index
    %c0_59 = arith.constant 0 : index
    %c0_60 = arith.constant 0 : index
    %c0_61 = arith.constant 0 : index
    %c0_62 = arith.constant 0 : index
    %133 = vector.load %arg5[%c0_58, %c0_59, %c0_60, %c0_61, %c0_62] : memref<1x2x2x80x4xf32, #tpu.memory_space<vmem>>, vector<1x1x1x80x4xf32>
    %134 = vector.shape_cast %133 : vector<1x1x1x80x4xf32> to vector<80x4xf32>
    %135 = vector.shape_cast %132 : vector<80x4xf32> to vector<1x1x1x80x4xf32>
    tpu.vector_store %arg5[%c0_58, %c0_59, %c0_60, %c0_61, %c0_62], %135 {strides = array<i32>} : memref<1x2x2x80x4xf32, #tpu.memory_space<vmem>>, vector<1x1x1x80x4xf32>,
    %136 = vector.broadcast %117 : vector<1x4xf32> to vector<80x4xf32>
    %137 = arith.subf %54, %136 : vector<80x4xf32>
    %138 = vector.broadcast %126 : vector<1x4xf32> to vector<80x4xf32>
    %139 = arith.mulf %137, %138 : vector<80x4xf32>
    %cst_63 = arith.constant 0.000000e+00 : f32
    %140 = vector.broadcast %cst_63 : f32 to vector<80x4xf32>
    %141 = arith.maximumf %139, %140 : vector<80x4xf32>
    %c0_64 = arith.constant 0 : index
    %c0_65 = arith.constant 0 : index
    %c1_66 = arith.constant 1 : index
    %c0_67 = arith.constant 0 : index
    %c0_68 = arith.constant 0 : index
    %142 = vector.load %arg5[%c0_64, %c0_65, %c1_66, %c0_67, %c0_68] : memref<1x2x2x80x4xf32, #tpu.memory_space<vmem>>, vector<1x1x1x80x4xf32>
    %143 = vector.shape_cast %142 : vector<1x1x1x80x4xf32> to vector<80x4xf32>
    %144 = vector.shape_cast %141 : vector<80x4xf32> to vector<1x1x1x80x4xf32>
    tpu.vector_store %arg5[%c0_64, %c0_65, %c1_66, %c0_67, %c0_68], %144 {strides = array<i32>} : memref<1x2x2x80x4xf32, #tpu.memory_space<vmem>>, vector<1x1x1x80x4xf32>,
    %145 = vector.broadcast %117 : vector<1x4xf32> to vector<80x4xf32>
    %146 = arith.subf %69, %145 : vector<80x4xf32>
    %147 = vector.broadcast %126 : vector<1x4xf32> to vector<80x4xf32>
    %148 = arith.mulf %146, %147 : vector<80x4xf32>
    %cst_69 = arith.constant 0.000000e+00 : f32
    %149 = vector.broadcast %cst_69 : f32 to vector<80x4xf32>
    %150 = arith.maximumf %148, %149 : vector<80x4xf32>
    %c0_70 = arith.constant 0 : index
    %c1_71 = arith.constant 1 : index
    %c0_72 = arith.constant 0 : index
    %c0_73 = arith.constant 0 : index
    %c0_74 = arith.constant 0 : index
    %151 = vector.load %arg5[%c0_70, %c1_71, %c0_72, %c0_73, %c0_74] : memref<1x2x2x80x4xf32, #tpu.memory_space<vmem>>, vector<1x1x1x80x4xf32>
    %152 = vector.shape_cast %151 : vector<1x1x1x80x4xf32> to vector<80x4xf32>
    %153 = vector.shape_cast %150 : vector<80x4xf32> to vector<1x1x1x80x4xf32>
    tpu.vector_store %arg5[%c0_70, %c1_71, %c0_72, %c0_73, %c0_74], %153 {strides = array<i32>} : memref<1x2x2x80x4xf32, #tpu.memory_space<vmem>>, vector<1x1x1x80x4xf32>,
    %154 = vector.broadcast %117 : vector<1x4xf32> to vector<80x4xf32>
    %155 = arith.subf %77, %154 : vector<80x4xf32>
    %156 = vector.broadcast %126 : vector<1x4xf32> to vector<80x4xf32>
    %157 = arith.mulf %155, %156 : vector<80x4xf32>
    %cst_75 = arith.constant 0.000000e+00 : f32
    %158 = vector.broadcast %cst_75 : f32 to vector<80x4xf32>
    %159 = arith.maximumf %157, %158 : vector<80x4xf32>
    %c0_76 = arith.constant 0 : index
    %c1_77 = arith.constant 1 : index
    %c1_78 = arith.constant 1 : index
    %c0_79 = arith.constant 0 : index
    %c0_80 = arith.constant 0 : index
    %160 = vector.load %arg5[%c0_76, %c1_77, %c1_78, %c0_79, %c0_80] : memref<1x2x2x80x4xf32, #tpu.memory_space<vmem>>, vector<1x1x1x80x4xf32>
    %161 = vector.shape_cast %160 : vector<1x1x1x80x4xf32> to vector<80x4xf32>
    %162 = vector.shape_cast %159 : vector<80x4xf32> to vector<1x1x1x80x4xf32>
    tpu.vector_store %arg5[%c0_76, %c1_77, %c1_78, %c0_79, %c0_80], %162 {strides = array<i32>} : memref<1x2x2x80x4xf32, #tpu.memory_space<vmem>>, vector<1x1x1x80x4xf32>,
    return
  }
  func.func @transform_0(%arg0: i32, %arg1: i32) -> (i32, i32, i32) {
    %c0_i32 = arith.constant 0 : i32
    %c0_i32_0 = arith.constant 0 : i32
    %c0_i32_1 = arith.constant 0 : i32
    return %arg0, %c0_i32, %c0_i32_0 : i32, i32, i32
  }
  func.func @transform_1(%arg0: i32, %arg1: i32) -> (i32, i32) {
    %c0_i32 = arith.constant 0 : i32
    %c0_i32_0 = arith.constant 0 : i32
    return %c0_i32, %arg1 : i32, i32
  }
  func.func @transform_2(%arg0: i32, %arg1: i32) -> (i32, i32) {
    %c0_i32 = arith.constant 0 : i32
    %c0_i32_0 = arith.constant 0 : i32
    %c0_i32_1 = arith.constant 0 : i32
    return %c0_i32, %c0_i32_0 : i32, i32
  }
  func.func @transform_3(%arg0: i32, %arg1: i32) -> (i32, i32, i32, i32, i32) {
    %c0_i32 = arith.constant 0 : i32
    %c0_i32_0 = arith.constant 0 : i32
    %c0_i32_1 = arith.constant 0 : i32
    %c0_i32_2 = arith.constant 0 : i32
    return %arg0, %c0_i32, %c0_i32_0, %c0_i32_1, %arg1 : i32, i32, i32, i32, i32
  }
}

</mosaic_0001>

<bundles_post_ra>
// kernel: unet_up_forward.1
= control target key start
LH: loop header
LB: loop body
LE: loop exit
PB: predicated region body
PF: predicated region fallthrough
CT: control target
= control target key end

     0   :  { %s2848_s12 = smov 0   ;;  %s2850_s13 = smov 0   ;;  %s4047_s0 = inlined_call_operand.vmem [shape: f32[2,110,8], index: 0, kind: input, shape index: {}]   ;;  %s4048_s1 = inlined_call_operand.vmem [shape: bf16[8,64], index: 1, kind: input, shape index: {}]   ;;  %s4049_s2 = inlined_call_operand.vmem [shape: f32[80,1], index: 2, kind: input, shape index: {}]   ;;  %s4050_s3 = inlined_call_operand.vmem [shape: f32[2,2,2,80,4], index: 3, kind: output, shape index: {}]  }
   0x1   :  { %s2852_s14 = smov 0  }
   0x2 LB: > { %s25_s15 = sadd.s32 1, %s2808_s13  ;;  %p2410_p0 = scmp.ge.s32.totalorder %s2812_s14, 1  ;;  %s2812_s14 = sphi %s2852_s14, %s13_s14   ;;  %s2808_s13 = sphi %s2850_s13, %s4118_s13   ;;  %s2804_s12 = sphi %s2848_s12, %s4117_s12  }
   0x3   : > { %p27_p1 = scmp.ge.s32.totalorder %s25_s15, 2  ;;  %p160_p2 = scmp.lt.s32.totalorder %s2812_s14, 3 }
   0x5   : > { %s4120_s15 = smov (%p27_p1, %s25_s15), 0  ;;  %p161_p3 = pnand %p2410_p0, %p160_p2 }
   0x7   : > { %164 = sbr.rel (%p161_p3) target bundleno = 1138 (0x472), region = 32 }
   0xe   : > { %v234_v0 = vld [vmem:[%s4048_s1] sm:$0xf]  ;;  %v2814_v2 = vmov 0.0   ;;  %vm2815_vm0 = vmmov 0   ;;  %s2816_s18 = smov 124   ;;  %s2817_s19 = smov 112  }
   0xf   : > { %v2413_v1 = vcombine.low %v234_v0, %v234_v0  ;;  %2545 = vmatprep.subr.bf16.mxu0 %v2814_v2  ;;  %2743 = vmatprep.subr.bf16.mxu1 %v2814_v2  ;;  %s2818_s20 = smov 116   ;;  %s2819_s21 = smov 104   ;;  %vm271_vm1 = vcmask 1043456   ;;  %vm255_vm2 = vcmask 64512   ;;  %v209_v18 = vld [vmem:[%s4049_s2] sm:$0xff]  ;;  %v210_v19 = vld [vmem:[%s4049_s2 + $0x8] sm:$0xff] }
  0x10   : > { %2547 = vmatprep.mubr.msk.bf16.mxu0 %vm2815_vm0, %v2814_v2  ;;  %2559 = vmatprep.mubr.msk.bf16.mxu1 %vm2815_vm0, %v2814_v2  ;;  %s2820_s22 = smov 88   ;;  %s2821_s23 = smov 80   ;;  %v364_v11 = vsel %vm271_vm1, %v234_v0, 0  ;;  %v2824_v22 = vmov 0   ;;  %v211_v24 = vld [vmem:[%s4049_s2 + $0x10] sm:$0xff]  ;;  %v212_v29 = vld [vmem:[%s4049_s2 + $0x18] sm:$0xff] }
  0x11   : > { %253 = vrot.lane.b32.xlu0 %v2413_v1, %s2816_s18  ;;  %622 = vrot.lane.b32.xlu1 %v2413_v1, %s2817_s19  ;;  %s2822_s24 = smov 76   ;;  %s2823_s25 = smov 68   ;;  %v213_v34 = vld [vmem:[%s4049_s2 + $0x20] sm:$0xff]  ;;  %v214_v41 = vld [vmem:[%s4049_s2 + $0x28] sm:$0xff]  ;;  %vm1695_vm3 = vcmask 31744   ;;  %vm1768_vm4 = vcmask 64544  }
  0x12   : > { %p191_p4 = scmp.lt.s32.totalorder %s2804_s12, 1  ;;  %2785 = vset.pattern.permute.xlu0 %v2824_v22  ;;  %2786 = vset.pattern.permute.xlu1 %v2824_v22  ;;  %v215_v44 = vld [vmem:[%s4049_s2 + $0x30] sm:$0xff]  ;;  %v216_v45 = vld [vmem:[%s4049_s2 + $0x38] sm:$0xff]  ;;  %v217_v51 = vld [vmem:[%s4049_s2 + $0x40] sm:$0xff]  ;;  %s2826_s30 = smov 8   ;;  %vm1929_vm5 = vcmask 130144  }
  0x13   : > { %v218_v52 = vld [vmem:[%s4049_s2 + $0x48] sm:$0xff]  ;;  %s2827_s4 = smov 12  }
  0x14   : > { %s4122_s12 = smov (!%p191_p4, %s2804_s12), 1 }
  0x15   : > { %464 = vrot.lane.b32.xlu0 %v2413_v1, %s2818_s20  ;;  %750 = vrot.lane.b32.xlu1 %v2413_v1, %s2819_s21  ;;  %s2745_s26 = smul.u32 112, %s4122_s12 }
  0x16   : > { %s2746_s5 = smul.u32 320, %s4122_s12 }
  0x17   : > { %s2887_s29 = scalar_lea.vmem %s4047_s0, %s2745_s26 }
  0x18   : > { %v235_v3 = vld [vmem:[%s2887_s29 + $0x1] sm:$0xff]  ;;  %v236_v4 = vld [vmem:[%s2887_s29 + $0x9] sm:$0xff]  ;;  %v241_v5 = vld [vmem:[%s2887_s29 + $0x31] sm:$0xff]  ;;  %s3851_s8 = scalar_lea.vmem %s4050_s3, %s2746_s5 }
  0x19   : > { %938 = vrot.lane.b32.xlu0 %v2413_v1, %s2820_s22  ;;  %1136 = vrot.lane.b32.xlu1 %v2413_v1, %s2821_s23  ;;  %v242_v6 = vld [vmem:[%s2887_s29 + $0x39] sm:$0xff]  ;;  %v245_v9 = vpack.c.bf16 %v236_v4, %v235_v3  ;;  %v237_v14 = vld [vmem:[%s2887_s29 + $0x11] sm:$0xff] }
  0x1a   : > { %v248_v10 = vpack.c.bf16 %v242_v6, %v241_v5  ;;  %v238_v15 = vld [vmem:[%s2887_s29 + $0x19] sm:$0xff]  ;;  %v243_v16 = vld [vmem:[%s2887_s29 + $0x41] sm:$0xff]  ;;  %v244_v17 = vld [vmem:[%s2887_s29 + $0x49] sm:$0xff] }
  0x1b   : > { %v246_v20 = vpack.c.bf16 %v238_v15, %v237_v14  ;;  %v249_v21 = vpack.c.bf16 %v244_v17, %v243_v16  ;;  %v239_v23 = vld [vmem:[%s2887_s29 + $0x21] sm:$0xff]  ;;  %v240_v25 = vld [vmem:[%s2887_s29 + $0x29] sm:$0xff]  ;;  %v222_v35 = vld [vmem:[%s2887_s29 + $0x18] sm:$0xff] }
  0x1c   : > { %v219_v26 = vld [vmem:[%s2887_s29] sm:$0xff]  ;;  %v220_v27 = vld [vmem:[%s2887_s29 + $0x8] sm:$0xff]  ;;  %v247_v30 = vpack.c.bf16 %v240_v25, %v239_v23  ;;  %v221_v33 = vld [vmem:[%s2887_s29 + $0x10] sm:$0xff] }
  0x1d   : > { %1294 = vrot.lane.b32.xlu0 %v2413_v1, %s2822_s24  ;;  %1492 = vrot.lane.b32.xlu1 %v2413_v1, %s2823_s25  ;;  %v229_v31 = vpack.c.bf16 %v220_v27, %v219_v26  ;;  %v449_v36 = vld [vmem:[%s2887_s29 + $0x2] sm:$0xff]  ;;  %v450_v37 = vld [vmem:[%s2887_s29 + $0xa] sm:$0xff]  ;;  %v230_v39 = vpack.c.bf16 %v222_v35, %v221_v33 }
  0x1e   : > { %v459_v40 = vpack.c.bf16 %v450_v37, %v449_v36  ;;  %v223_v43 = vld [vmem:[%s2887_s29 + $0x20] sm:$0xff]  ;;  %v224_v46 = vld [vmem:[%s2887_s29 + $0x28] sm:$0xff]  ;;  %v451_v47 = vld [vmem:[%s2887_s29 + $0x12] sm:$0xff] }
  0x1f   : > { %v452_v48 = vld [vmem:[%s2887_s29 + $0x1a] sm:$0xff]  ;;  %v231_v49 = vpack.c.bf16 %v224_v46, %v223_v43  ;;  %v225_v53 = vld [vmem:[%s2887_s29 + $0x30] sm:$0xff]  ;;  %v453_v55 = vld [vmem:[%s2887_s29 + $0x22] sm:$0xff]  ;;  %v617_v6 = vpack.c.bf16 %v451_v47, %v450_v37 }
  0x20   : > { %v460_v50 = vpack.c.bf16 %v452_v48, %v451_v47  ;;  %v226_v54 = vld [vmem:[%s2887_s29 + $0x38] sm:$0xff]  ;;  %v454_v56 = vld [vmem:[%s2887_s29 + $0x2a] sm:$0xff]  ;;  %v227_v59 = vld [vmem:[%s2887_s29 + $0x40] sm:$0xff] }
  0x21   : > { %1637 = vperm.xlu0 %2785, %v209_v18   ;;  %1642 = vperm.xlu1 %2786, %v210_v19   ;;  %v232_v57 = vpack.c.bf16 %v226_v54, %v225_v53  ;;  %v461_v58 = vpack.c.bf16 %v454_v56, %v453_v55  ;;  %v228_v60 = vld [vmem:[%s2887_s29 + $0x48] sm:$0xff]  ;;  %v455_v61 = vld [vmem:[%s2887_s29 + $0x32] sm:$0xff]  ;;  %v456_v62 = vld [vmem:[%s2887_s29 + $0x3a] sm:$0xff] }
  0x22   : > { %v233_v63 = vpack.c.bf16 %v228_v60, %v227_v59  ;;  %v462_v0 = vpack.c.bf16 %v456_v62, %v455_v61  ;;  %v457_v1 = vld [vmem:[%s2887_s29 + $0x42] sm:$0xff]  ;;  %v458_v3 = vld [vmem:[%s2887_s29 + $0x4a] sm:$0xff]  ;;  %v619_v16 = vpack.c.bf16 %v455_v61, %v454_v56  ;;  %v740_v19 = vld [vmem:[%s2887_s29 + $0x33] sm:$0xff] }
  0x23   : > { %v463_v5 = vpack.c.bf16 %v458_v3, %v457_v1  ;;  %v737_v14 = vld [vmem:[%s2887_s29 + $0x1b] sm:$0xff]  ;;  %v738_v15 = vld [vmem:[%s2887_s29 + $0x23] sm:$0xff]  ;;  %v739_v18 = vld [vmem:[%s2887_s29 + $0x2b] sm:$0xff] }
  0x24   : > { %v746_v17 = vpack.c.bf16 %v738_v15, %v737_v14  ;;  %v616_v22 = vld [vmem:[%s2887_s29 + $0x52] sm:$0xff]  ;;  %v741_v23 = vld [vmem:[%s2887_s29 + $0x3b] sm:$0xff]  ;;  %v926_v36 = vld [vmem:[%s2887_s29 + $0x24] sm:$0xff] }
  0x25   : > { %1647 = vperm.xlu1 %2786, %v211_v24   ;;  %1657 = vperm.xlu0 %2785, %v213_v34   ;;  %v742_v24 = vld [vmem:[%s2887_s29 + $0x43] sm:$0xff]  ;;  %v621_v25 = vpack.c.bf16 %v616_v22, %v458_v3  ;;  %v743_v27 = vld [vmem:[%s2887_s29 + $0x4b] sm:$0xff]  ;;  %v1279_v53 = vld [vmem:[%s2887_s29 + $0x15] sm:$0xff] }
  0x26   : > { %v748_v26 = vpack.c.bf16 %v742_v24, %v741_v23  ;;  %v925_v35 = vld [vmem:[%s2887_s29 + $0x1c] sm:$0xff]  ;;  %v930_v46 = vld [vmem:[%s2887_s29 + $0x44] sm:$0xff]  ;;  %v1282_v59 = vld [vmem:[%s2887_s29 + $0x2d] sm:$0xff] }
  0x27   : > { %v934_v37 = vpack.c.bf16 %v926_v36, %v925_v35  ;;  %v1280_v54 = vld [vmem:[%s2887_s29 + $0x1d] sm:$0xff]  ;;  %v1283_v3 = vld [vmem:[%s2887_s29 + $0x35] sm:$0xff] }
  0x28   : > { %v1289_v56 = vpack.c.bf16 %v1280_v54, %v1279_v53  ;;  %v1477_v60 = vld [vmem:[%s2887_s29 + $0x16] sm:$0xff]  ;;  %v1478_v61 = vld [vmem:[%s2887_s29 + $0x1e] sm:$0xff]  ;;  %v1484_v14 = vld [vmem:[%s2887_s29 + $0x4e] sm:$0xff] }
  0x29   : > { %1652 = vperm.xlu1 %2786, %v212_v29   ;;  %1662 = vperm.xlu0 %2785, %v214_v41   ;;  %v923_v29 = vld [vmem:[%s2887_s29 + $0xc] sm:$0xff]  ;;  %v1287_v15 = vld [vmem:[%s2887_s29 + $0x55] sm:$0xff] }
  0x2a   : > { %v1124_v41 = vld [vmem:[%s2887_s29 + $0x2c] sm:$0xff] }
  0x2b   : > { %v1132_v43 = vpack.c.bf16 %v1124_v41, %v926_v36 }
  0x2d   : > { %1667 = vperm.xlu0 %2785, %v215_v44   ;;  %1672 = vperm.xlu1 %2786, %v216_v45   ;;  %v929_v45 = vld [vmem:[%s2887_s29 + $0x3c] sm:$0xff] }
  0x2e   : > { %v936_v47 = vpack.c.bf16 %v930_v46, %v929_v45 }
  0x31   : > { %1677 = vperm.xlu0 %2785, %v217_v51   ;;  %1682 = vperm.xlu1 %2786, %v218_v52  }
  0x83   : > { %v254_v7 = vpop.permute.xlu0 %253  ;;  %v623_v28 = vpop.permute.xlu1 %622 }
  0x84   : > { %v273_v8 = vsel %vm271_vm1, %v254_v7, 0  ;;  %v640_v32 = vsel %vm271_vm1, %v623_v28, 0  ;;  %v744_v28 = vld [vmem:[%s2887_s29 + $0x53] sm:$0xff] }
  0x85   : > { %2546 = vmatpush3.bf16.msra.mxu0 %v273_v8  ;;  %2744 = vmatpush3.bf16.msra.mxu1 %v273_v8  ;;  %v735_v8 = vld [vmem:[%s2887_s29 + $0xb] sm:$0xff] }
  0x86   : > { %2589 = vmatprep.subr.bf16.mxu0 %v2814_v2  ;;  %2567 = vmatprep.subr.bf16.mxu1 %v2814_v2 }
  0x87   : > { %v465_v12 = vpop.permute.xlu0 %464  ;;  %v751_v38 = vpop.permute.xlu1 %750 }
  0x88   : > { %v482_v13 = vsel %vm271_vm1, %v465_v12, 0  ;;  %2548 = vmatmul.mubr.msk.bf16.vlgmr.msra.gmra.mrb[0].mxu0 %vm255_vm2, %v245_v9  ;;  %2560 = vmatmul.mubr.msk.bf16.vlgmr.msra.gmra.mrb[0].mxu1 %vm255_vm2, %v248_v10  ;;  %v768_v42 = vsel %vm271_vm1, %v751_v38, 0  ;;  %v736_v9 = vld [vmem:[%s2887_s29 + $0x13] sm:$0xff]  ;;  %v618_v10 = vpack.c.bf16 %v453_v55, %v452_v48  ;;  %v1130_v55 = vld [vmem:[%s2887_s29 + $0x5c] sm:$0xff] }
  0x89   : > { %2590 = vmatpush3.bf16.msra.mxu0 %v482_v13  ;;  %2568 = vmatpush3.bf16.msra.mxu1 %v364_v11  ;;  %v745_v11 = vpack.c.bf16 %v736_v9, %v735_v8  ;;  %v1482_v8 = vld [vmem:[%s2887_s29 + $0x3e] sm:$0xff] }
  0x8a   : > { %2551 = vmatprep.mubr.msk.bf16.mxu0 %vm2815_vm0, %v2814_v2  ;;  %2563 = vmatprep.mubr.msk.bf16.mxu1 %vm2815_vm0, %v2814_v2  ;;  %v1285_v9 = vld [vmem:[%s2887_s29 + $0x45] sm:$0xff] }
  0x8b   : > { %2611 = vmatprep.subr.bf16.mxu1 %v2814_v2  ;;  %2633 = vmatprep.subr.bf16.mxu0 %v2814_v2  ;;  %v939_v4 = vpop.permute.xlu0 %938  ;;  %v1137_v12 = vpop.permute.xlu1 %1136 }
  0x8c   : > { %v956_v7 = vsel %vm271_vm1, %v939_v4, 0  ;;  %v1154_v13 = vsel %vm271_vm1, %v1137_v12, 0  ;;  %v1284_v4 = vld [vmem:[%s2887_s29 + $0x3d] sm:$0xff] }
  0x8f   : > { %v1295_v33 = vpop.permute.xlu0 %1294 }
  0x90   : > { %2552 = vmatmul.mubr.msk.bf16.gmra.mrb[4].mxu0 %vm255_vm2, %v246_v20  ;;  %2564 = vmatmul.mubr.msk.bf16.gmra.mrb[4].mxu1 %vm255_vm2, %v249_v21  ;;  %v620_v20 = vpack.c.bf16 %v457_v1, %v456_v62  ;;  %v747_v21 = vpack.c.bf16 %v740_v19, %v739_v18  ;;  %v1312_v34 = vsel %vm271_vm1, %v1295_v33, 0  ;;  %v1480_v1 = vld [vmem:[%s2887_s29 + $0x2e] sm:$0xff]  ;;  %v1485_v19 = vld [vmem:[%s2887_s29 + $0x56] sm:$0xff] }
  0x91   : > { %2555 = vmatprep.mubr.msk.bf16.mxu0 %vm2815_vm0, %v2814_v2  ;;  %2569 = vmatprep.mubr.msk.bf16.mxu1 %vm2815_vm0, %v2814_v2 }
  0x98   : > { %2556 = vmatmul.mubr.msk.bf16.gmra.mrb[8].mxu0 %vm255_vm2, %v247_v30  ;;  %2570 = vmatmul.mubr.msk.bf16.vlgmr.msra.gmra.mrb[8].mxu1 %vm255_vm2, %v229_v31  ;;  %v924_v30 = vld [vmem:[%s2887_s29 + $0x14] sm:$0xff]  ;;  %v749_v31 = vpack.c.bf16 %v744_v28, %v743_v27 }
  0x99   : > { %2612 = vmatpush3.bf16.msra.mxu1 %v640_v32  ;;  %2573 = vmatprep.mubr.msk.bf16.mxu1 %vm2815_vm0, %v2814_v2  ;;  %v933_v32 = vpack.c.bf16 %v924_v30, %v923_v29  ;;  %v1131_v38 = vpack.c.bf16 %v925_v35, %v924_v30 }
  0x9a   : > { %2591 = vmatprep.mubr.msk.bf16.mxu0 %vm2815_vm0, %v2814_v2  ;;  %2655 = vmatprep.subr.bf16.mxu1 %v2814_v2 }
  0xa0   : > { %2574 = vmatmul.mubr.msk.bf16.gmra.mrb[12].mxu1 %vm255_vm2, %v230_v39  ;;  %2592 = vmatmul.mubr.msk.bf16.vlgmr.msra.gmra.mrb[12].mxu0 %vm255_vm2, %v459_v40  ;;  %v1493_v39 = vpop.permute.xlu1 %1492 }
  0xa1   : > { %2634 = vmatpush3.bf16.msra.mxu0 %v768_v42  ;;  %2577 = vmatprep.mubr.msk.bf16.mxu1 %vm2815_vm0, %v2814_v2  ;;  %v1510_v40 = vsel %vm271_vm1, %v1493_v39, 0  ;;  %v928_v42 = vld [vmem:[%s2887_s29 + $0x34] sm:$0xff] }
  0xa2   : > { %2595 = vmatprep.mubr.msk.bf16.mxu0 %vm2815_vm0, %v2814_v2  ;;  %2677 = vmatprep.subr.bf16.mxu0 %v2814_v2  ;;  %v935_v44 = vpack.c.bf16 %v928_v42, %v1124_v41  ;;  %v1133_v48 = vpack.c.bf16 %v929_v45, %v928_v42 }
  0xa8   : > { %2578 = vmatmul.mubr.msk.bf16.gmra.mrb[16].mxu1 %vm255_vm2, %v231_v49  ;;  %2596 = vmatmul.mubr.msk.bf16.gmra.mrb[16].mxu0 %vm255_vm2, %v460_v50  ;;  %v931_v49 = vld [vmem:[%s2887_s29 + $0x4c] sm:$0xff]  ;;  %v932_v50 = vld [vmem:[%s2887_s29 + $0x54] sm:$0xff] }
  0xa9   : > { %2581 = vmatprep.mubr.msk.bf16.mxu1 %vm2815_vm0, %v2814_v2  ;;  %2599 = vmatprep.mubr.msk.bf16.mxu0 %vm2815_vm0, %v2814_v2  ;;  %v937_v51 = vpack.c.bf16 %v932_v50, %v931_v49  ;;  %v1134_v52 = vpack.c.bf16 %v931_v49, %v930_v46 }
  0xb0   : > { %2582 = vmatmul.mubr.msk.bf16.gmra.mrb[20].mxu1 %vm255_vm2, %v232_v57  ;;  %2600 = vmatmul.mubr.msk.bf16.gmra.mrb[20].mxu0 %vm255_vm2, %v461_v58  ;;  %v1135_v57 = vpack.c.bf16 %v1130_v55, %v932_v50  ;;  %v1281_v58 = vld [vmem:[%s2887_s29 + $0x25] sm:$0xff] }
  0xb1   : > { %2585 = vmatprep.mubr.msk.bf16.mxu1 %vm2815_vm0, %v2814_v2  ;;  %2603 = vmatprep.mubr.msk.bf16.mxu0 %vm2815_vm0, %v2814_v2  ;;  %v1290_v62 = vpack.c.bf16 %v1282_v59, %v1281_v58 }
  0xb8   : > { %2586 = vmatmul.mubr.msk.bf16.gmra.mrb[24].mxu1 %vm255_vm2, %v233_v63  ;;  %2604 = vmatmul.mubr.msk.bf16.gmra.mrb[24].mxu0 %vm255_vm2, %v462_v0  ;;  %v1487_v63 = vpack.c.bf16 %v1478_v61, %v1477_v60  ;;  %v1479_v0 = vld [vmem:[%s2887_s29 + $0x26] sm:$0xff] }
  0xb9   : > { %2607 = vmatprep.mubr.msk.bf16.mxu0 %vm2815_vm0, %v2814_v2  ;;  %2613 = vmatprep.mubr.msk.bf16.mxu1 %vm2815_vm0, %v2814_v2 }
  0xc0   : > { %2608 = vmatmul.mubr.msk.bf16.gmra.mrb[28].mxu0 %vm255_vm2, %v463_v5  ;;  %2614 = vmatmul.mubr.msk.bf16.vlgmr.msra.gmra.mrb[28].mxu1 %vm255_vm2, %v617_v6  ;;  %v1488_v5 = vpack.c.bf16 %v1480_v1, %v1479_v0  ;;  %v1291_v6 = vpack.c.bf16 %v1284_v4, %v1283_v3 }
  0xc1   : > { %2656 = vmatpush3.bf16.msra.mxu1 %v956_v7  ;;  %2617 = vmatprep.mubr.msk.bf16.mxu1 %vm2815_vm0, %v2814_v2  ;;  %v1481_v7 = vld [vmem:[%s2887_s29 + $0x36] sm:$0xff] }
  0xc2   : > { %2635 = vmatprep.mubr.msk.bf16.mxu0 %vm2815_vm0, %v2814_v2  ;;  %2699 = vmatprep.subr.bf16.mxu1 %v2814_v2 }
  0xc8   : > { %2618 = vmatmul.mubr.msk.bf16.gmra.mrb[32].mxu1 %vm255_vm2, %v618_v10  ;;  %2636 = vmatmul.mubr.msk.bf16.vlgmr.msra.gmra.mrb[32].mxu0 %vm255_vm2, %v745_v11  ;;  %v1286_v10 = vld [vmem:[%s2887_s29 + $0x4d] sm:$0xff]  ;;  %v1489_v11 = vpack.c.bf16 %v1482_v8, %v1481_v7 }
  0xc9   : > { %2621 = vmatprep.mubr.msk.bf16.mxu1 %vm2815_vm0, %v2814_v2  ;;  %2639 = vmatprep.mubr.msk.bf16.mxu0 %vm2815_vm0, %v2814_v2  ;;  %v1292_v12 = vpack.c.bf16 %v1286_v10, %v1285_v9 }
  0xca   : > { %2678 = vmatpush3.bf16.msra.mxu0 %v1154_v13  ;;  %v1483_v13 = vld [vmem:[%s2887_s29 + $0x46] sm:$0xff] }
  0xcb   : > { %2721 = vmatprep.subr.bf16.mxu0 %v2814_v2 }
  0xd0   : > { %2622 = vmatmul.mubr.msk.bf16.gmra.mrb[36].mxu1 %vm255_vm2, %v619_v16  ;;  %2640 = vmatmul.mubr.msk.bf16.gmra.mrb[36].mxu0 %vm255_vm2, %v746_v17  ;;  %v1288_v16 = vld [vmem:[%s2887_s29 + $0x5d] sm:$0xff]  ;;  %v1490_v17 = vpack.c.bf16 %v1484_v14, %v1483_v13 }
  0xd1   : > { %2625 = vmatprep.mubr.msk.bf16.mxu1 %vm2815_vm0, %v2814_v2  ;;  %2643 = vmatprep.mubr.msk.bf16.mxu0 %vm2815_vm0, %v2814_v2  ;;  %v1293_v18 = vpack.c.bf16 %v1288_v16, %v1287_v15 }
  0xd8   : > { %2626 = vmatmul.mubr.msk.bf16.gmra.mrb[40].mxu1 %vm255_vm2, %v620_v20  ;;  %2644 = vmatmul.mubr.msk.bf16.gmra.mrb[40].mxu0 %vm255_vm2, %v747_v21  ;;  %v1486_v20 = vld [vmem:[%s2887_s29 + $0x5e] sm:$0xff]  ;;  %s2825_s29 = smov 4  }
  0xd9   : > { %2629 = vmatprep.mubr.msk.bf16.mxu1 %vm2815_vm0, %v2814_v2  ;;  %2647 = vmatprep.mubr.msk.bf16.mxu0 %vm2815_vm0, %v2814_v2  ;;  %v1491_v21 = vpack.c.bf16 %v1486_v20, %v1485_v19 }
  0xe0   : > { %2630 = vmatmul.mubr.msk.bf16.gmra.mrb[44].mxu1 %vm255_vm2, %v621_v25  ;;  %2648 = vmatmul.mubr.msk.bf16.gmra.mrb[44].mxu0 %vm255_vm2, %v748_v26 }
  0xe1   : > { %2651 = vmatprep.mubr.msk.bf16.mxu0 %vm2815_vm0, %v2814_v2  ;;  %2657 = vmatprep.mubr.msk.bf16.mxu1 %vm2815_vm0, %v2814_v2 }
  0xe8   : > { %2652 = vmatmul.mubr.msk.bf16.gmra.mrb[48].mxu0 %vm255_vm2, %v749_v31  ;;  %2658 = vmatmul.mubr.msk.bf16.vlgmr.msra.gmra.mrb[48].mxu1 %vm255_vm2, %v933_v32 }
  0xe9   : > { %2661 = vmatprep.mubr.msk.bf16.mxu1 %vm2815_vm0, %v2814_v2  ;;  %2679 = vmatprep.mubr.msk.bf16.mxu0 %vm2815_vm0, %v2814_v2 }
  0xea   : > { %2700 = vmatpush3.bf16.msra.mxu1 %v1312_v34 }
  0xf0   : > { %2662 = vmatmul.mubr.msk.bf16.gmra.mrb[52].mxu1 %vm255_vm2, %v934_v37  ;;  %2680 = vmatmul.mubr.msk.bf16.vlgmr.msra.gmra.mrb[52].mxu0 %vm255_vm2, %v1131_v38 }
  0xf1   : > { %2683 = vmatprep.mubr.msk.bf16.mxu0 %vm2815_vm0, %v2814_v2  ;;  %2665 = vmatprep.mubr.msk.bf16.mxu1 %vm2815_vm0, %v2814_v2 }
  0xf2   : > { %2722 = vmatpush3.bf16.msra.mxu0 %v1510_v40 }
  0xf8   : > { %2684 = vmatmul.mubr.msk.bf16.gmra.mrb[56].mxu0 %vm255_vm2, %v1132_v43  ;;  %2666 = vmatmul.mubr.msk.bf16.gmra.mrb[56].mxu1 %vm255_vm2, %v935_v44 }
  0xf9   : > { %2669 = vmatprep.mubr.msk.bf16.mxu1 %vm2815_vm0, %v2814_v2  ;;  %2687 = vmatprep.mubr.msk.bf16.mxu0 %vm2815_vm0, %v2814_v2 }
 0x100   : > { %2670 = vmatmul.mubr.msk.bf16.gmra.mrb[60].mxu1 %vm255_vm2, %v936_v47  ;;  %2688 = vmatmul.mubr.msk.bf16.gmra.mrb[60].mxu0 %vm255_vm2, %v1133_v48 }
 0x101   : > { %2673 = vmatprep.mubr.msk.bf16.mxu1 %vm2815_vm0, %v2814_v2  ;;  %2691 = vmatprep.mubr.msk.bf16.mxu0 %vm2815_vm0, %v2814_v2 }
 0x108   : > { %2674 = vmatmul.mubr.msk.bf16.gmra.mrb[64].mxu1 %vm255_vm2, %v937_v51  ;;  %2692 = vmatmul.mubr.msk.bf16.gmra.mrb[64].mxu0 %vm255_vm2, %v1134_v52 }
 0x109   : > { %2701 = vmatprep.mubr.msk.bf16.mxu1 %vm2815_vm0, %v2814_v2  ;;  %2695 = vmatprep.mubr.msk.bf16.mxu0 %vm2815_vm0, %v2814_v2 }
 0x110   : > { %2702 = vmatmul.mubr.msk.bf16.vlgmr.msra.gmra.mrb[68].mxu1 %vm255_vm2, %v1289_v56  ;;  %2696 = vmatmul.mubr.msk.bf16.gmra.mrb[68].mxu0 %vm255_vm2, %v1135_v57 }
 0x111   : > { %2705 = vmatprep.mubr.msk.bf16.mxu1 %vm2815_vm0, %v2814_v2  ;;  %2723 = vmatprep.mubr.msk.bf16.mxu0 %vm2815_vm0, %v2814_v2 }
 0x118   : > { %2706 = vmatmul.mubr.msk.bf16.gmra.mrb[72].mxu1 %vm255_vm2, %v1290_v62  ;;  %2724 = vmatmul.mubr.msk.bf16.vlgmr.msra.gmra.mrb[72].mxu0 %vm255_vm2, %v1487_v63 }
 0x119   : > { %2727 = vmatprep.mubr.msk.bf16.mxu0 %vm2815_vm0, %v2814_v2  ;;  %2709 = vmatprep.mubr.msk.bf16.mxu1 %vm2815_vm0, %v2814_v2 }
 0x120   : > { %2728 = vmatmul.mubr.msk.bf16.gmra.mrb[76].mxu0 %vm255_vm2, %v1488_v5  ;;  %2710 = vmatmul.mubr.msk.bf16.gmra.mrb[76].mxu1 %vm255_vm2, %v1291_v6 }
 0x121   : > { %2731 = vmatprep.mubr.msk.bf16.mxu0 %vm2815_vm0, %v2814_v2  ;;  %2713 = vmatprep.mubr.msk.bf16.mxu1 %vm2815_vm0, %v2814_v2 }
 0x128   : > { %2732 = vmatmul.mubr.msk.bf16.gmra.mrb[80].mxu0 %vm255_vm2, %v1489_v11  ;;  %2714 = vmatmul.mubr.msk.bf16.gmra.mrb[80].mxu1 %vm255_vm2, %v1292_v12 }
 0x129   : > { %2735 = vmatprep.mubr.msk.bf16.mxu0 %vm2815_vm0, %v2814_v2  ;;  %2717 = vmatprep.mubr.msk.bf16.mxu1 %vm2815_vm0, %v2814_v2 }
 0x130   : > { %2736 = vmatmul.mubr.msk.bf16.gmra.mrb[84].mxu0 %vm255_vm2, %v1490_v17  ;;  %2718 = vmatmul.mubr.msk.bf16.gmra.mrb[84].mxu1 %vm255_vm2, %v1293_v18 }
 0x131   : > { %2739 = vmatprep.mubr.msk.bf16.mxu0 %vm2815_vm0, %v2814_v2 }
 0x138   : > { %2740 = vmatmul.mubr.msk.bf16.gmra.mrb[88].mxu0 %vm255_vm2, %v1491_v21 }
 0x15b   : > { %v3139_v22 = vpop.f32.mrb[0].mxu0  ;;  %v3141_v23 = vpop.f32.mrb[0].mxu1 }
 0x15c   : > { %v2549_v24 = vpop.f32.mrb[1].mxu0  ;;  %v2561_v25 = vpop.f32.mrb[1].mxu1 }
 0x15d   : > { %v3143_v26 = vpop.f32.mrb[2].mxu0  ;;  %v3145_v27 = vpop.f32.mrb[2].mxu1 }
 0x15e   : > { %v2550_v28 = vpop.f32.mrb[3].mxu0  ;;  %v2562_v29 = vpop.f32.mrb[3].mxu1 }
 0x15f   : > { %v3193_v28 = vpop.permute.xlu1 %1642 }
 0x163   : > { %v3147_v30 = vpop.f32.mrb[4].mxu0  ;;  %v3149_v2 = vpop.f32.mrb[4].mxu1 }
 0x164   : > { %v2553_v31 = vpop.f32.mrb[5].mxu0  ;;  %v2565_v32 = vpop.f32.mrb[5].mxu1 }
 0x165   : > { %v3151_v33 = vpop.f32.mrb[6].mxu0  ;;  %v3153_v34 = vpop.f32.mrb[6].mxu1 }
 0x166   : > { %v2554_v35 = vpop.f32.mrb[7].mxu0  ;;  %v2566_v36 = vpop.f32.mrb[7].mxu1 }
 0x16b   : > { %v3155_v37 = vpop.f32.mrb[8].mxu0  ;;  %v400_v38 = vpop.f32.mrb[8].mxu1 }
 0x16c   : > { %v401_v39 = vadd.f32 %v400_v38, %v3139_v22  ;;  %v2557_v40 = vpop.f32.mrb[9].mxu0  ;;  %v2571_v41 = vpop.f32.mrb[9].mxu1 }
 0x16d   : > { %v3158_v42 = vpop.f32.mrb[10].mxu0  ;;  %v403_v43 = vpop.f32.mrb[10].mxu1 }
 0x16e   : > { %v404_v44 = vadd.f32 %v403_v43, %v3143_v26  ;;  %v2558_v45 = vpop.f32.mrb[11].mxu0  ;;  %v2572_v46 = vpop.f32.mrb[11].mxu1 }
 0x16f   : > { %v3203_v46 = vpop.permute.xlu0 %1637 }
 0x173   : > { %v408_v47 = vpop.f32.mrb[12].mxu1  ;;  %v518_v48 = vpop.f32.mrb[12].mxu0 }
 0x174   : > { %v3162_v49 = vadd.f32 %v408_v47, %v3147_v30  ;;  %567 = vrot.lane.b32.xlu1 %v518_v48, %s2825_s29  ;;  %v2575_v50 = vpop.f32.mrb[13].mxu1  ;;  %v2593_v51 = vpop.f32.mrb[13].mxu0 }
 0x175   : > { %v411_v52 = vpop.f32.mrb[14].mxu1  ;;  %v521_v53 = vpop.f32.mrb[14].mxu0 }
 0x176   : > { %v3166_v54 = vadd.f32 %v411_v52, %v3151_v33  ;;  %569 = vrot.lane.b32.xlu0 %v521_v53, %s2825_s29  ;;  %v2576_v55 = vpop.f32.mrb[15].mxu1  ;;  %v2594_v56 = vpop.f32.mrb[15].mxu0 }
 0x177   : > { %v3205_v47 = vpop.permute.xlu1 %1647 }
 0x17b   : > { %v416_v57 = vpop.f32.mrb[16].mxu1  ;;  %v526_v58 = vpop.f32.mrb[16].mxu0 }
 0x17c   : > { %v3170_v59 = vadd.f32 %v416_v57, %v3155_v37  ;;  %571 = vrot.lane.b32.xlu0 %v526_v58, %s2825_s29  ;;  %v2579_v60 = vpop.f32.mrb[17].mxu1  ;;  %v2597_v61 = vpop.f32.mrb[17].mxu0 }
 0x17d   : > { %v419_v62 = vpop.f32.mrb[18].mxu1  ;;  %v529_v63 = vpop.f32.mrb[18].mxu0 }
 0x17e   : > { %v3174_v0 = vadd.f32 %v419_v62, %v3158_v42  ;;  %v2580_v1 = vpop.f32.mrb[19].mxu1  ;;  %v2598_v3 = vpop.f32.mrb[19].mxu0 }
 0x17f   : > { %v3237_v3 = vpop.permute.xlu1 %1652 }
 0x180   : > { %573 = vrot.lane.b32.xlu0 %v529_v63, %s2825_s29 }
 0x183   : > { %v424_v4 = vpop.f32.mrb[20].mxu1  ;;  %v534_v5 = vpop.f32.mrb[20].mxu0 }
 0x184   : > { %v3178_v6 = vadd.f32 %v424_v4, %v3141_v23  ;;  %575 = vrot.lane.b32.xlu1 %v534_v5, %s2825_s29  ;;  %v2583_v7 = vpop.f32.mrb[21].mxu1  ;;  %v2601_v8 = vpop.f32.mrb[21].mxu0 }
 0x185   : > { %v427_v9 = vpop.f32.mrb[22].mxu1  ;;  %v537_v10 = vpop.f32.mrb[22].mxu0 }
 0x186   : > { %v3182_v11 = vadd.f32 %v427_v9, %v3145_v27  ;;  %v2584_v12 = vpop.f32.mrb[23].mxu1  ;;  %v2602_v13 = vpop.f32.mrb[23].mxu0 }
 0x187   : > { %v3239_v4 = vpop.permute.xlu0 %1657 }
 0x188   : > { %577 = vrot.lane.b32.xlu1 %v537_v10, %s2825_s29 }
 0x18b   : > { %v432_v14 = vpop.f32.mrb[24].mxu1  ;;  %v542_v15 = vpop.f32.mrb[24].mxu0 }
 0x18c   : > { %v3186_v16 = vadd.f32 %v432_v14, %v3149_v2  ;;  %579 = vrot.lane.b32.xlu1 %v542_v15, %s2825_s29  ;;  %v2587_v17 = vpop.f32.mrb[25].mxu1  ;;  %v2605_v18 = vpop.f32.mrb[25].mxu0 }
 0x18d   : > { %v435_v19 = vpop.f32.mrb[26].mxu1  ;;  %v545_v20 = vpop.f32.mrb[26].mxu0 }
 0x18e   : > { %v3190_v21 = vadd.f32 %v435_v19, %v3153_v34  ;;  %581 = vrot.lane.b32.xlu0 %v545_v20, %s2825_s29  ;;  %v2588_v24 = vpop.f32.mrb[27].mxu1  ;;  %v2606_v25 = vpop.f32.mrb[27].mxu0 }
 0x193   : > { %v550_v29 = vpop.f32.mrb[28].mxu0  ;;  %v3195_v31 = vpop.f32.mrb[28].mxu1 }
 0x194   : > { %v715_v32 = vadd.f32 %v3195_v31, %v401_v39  ;;  %583 = vrot.lane.b32.xlu1 %v550_v29, %s2825_s29  ;;  %v2609_v35 = vpop.f32.mrb[29].mxu0  ;;  %v2615_v36 = vpop.f32.mrb[29].mxu1 }
 0x195   : > { %v553_v38 = vpop.f32.mrb[30].mxu0  ;;  %v3199_v40 = vpop.f32.mrb[30].mxu1 }
 0x196   : > { %v716_v41 = vadd.f32 %v3199_v40, %v404_v44  ;;  %585 = vrot.lane.b32.xlu0 %v553_v38, %s2825_s29  ;;  %v2610_v43 = vpop.f32.mrb[31].mxu0  ;;  %v2616_v45 = vpop.f32.mrb[31].mxu1 }
 0x197   : > { %v3274_v45 = vpop.permute.xlu0 %1662 }
 0x19b   : > { %v3207_v48 = vpop.f32.mrb[32].mxu1  ;;  %v3209_v39 = vpop.f32.mrb[32].mxu0 }
 0x19c   : > { %v717_v50 = vadd.f32 %v3207_v48, %v3162_v49  ;;  %v3214_v51 = vadd.f32 %v3209_v39, %v715_v32  ;;  %873 = vrot.lane.b32.xlu1 %v3209_v39, %s2816_s18  ;;  %v2619_v44 = vpop.f32.mrb[33].mxu1  ;;  %v2637_v52 = vpop.f32.mrb[33].mxu0 }
 0x19d   : > { %v3218_v53 = vpop.f32.mrb[34].mxu1  ;;  %v3220_v55 = vpop.f32.mrb[34].mxu0 }
 0x19e   : > { %4073 = vst [vmem:[#allocation2_spill] sm:$0xff] %v3214_v51  ;;  %v1685_v56 = vmul.f32 %v3203_v46, %v3214_v51  ;;  %v718_v57 = vadd.f32 %v3218_v53, %v3166_v54  ;;  %v3227_v49 = vadd.f32 %v3220_v55, %v716_v41  ;;  %875 = vrot.lane.b32.xlu0 %v3220_v55, %s2816_s18  ;;  %v2620_v58 = vpop.f32.mrb[35].mxu1  ;;  %v2638_v60 = vpop.f32.mrb[35].mxu0 }
 0x1a0   : > { %4074 = vst [vmem:[#allocation3_spill] sm:$0xff] %v3227_v49  ;;  %v1722_v61 = vmul.f32 %v1685_v56, %v3214_v51  ;;  %v1686_v62 = vmul.f32 %v3193_v28, %v3227_v49  ;;  %v1696_v63 = vsel %vm1695_vm3, %v1685_v56, 0.0 }
 0x1a2   : > { %v1697_v1 = vsel %vm1695_vm3, %v1686_v62, 0.0  ;;  %v1723_v54 = vmul.f32 %v1686_v62, %v3227_v49  ;;  %v1732_v9 = vsel %vm1695_vm3, %v1722_v61, 0.0 }
 0x1a3   : > { %v1698_v5 = vadd.f32 %v1697_v1, %v1696_v63  ;;  %v3241_v7 = vpop.f32.mrb[36].mxu1  ;;  %v3243_v8 = vpop.f32.mrb[36].mxu0 }
 0x1a4   : > { %v1733_v10 = vsel %vm1695_vm3, %v1723_v54, 0.0  ;;  %v719_v12 = vadd.f32 %v3241_v7, %v3170_v59  ;;  %v3250_v13 = vadd.f32 %v3243_v8, %v717_v50  ;;  %877 = vrot.lane.b32.xlu1 %v3243_v8, %s2816_s18  ;;  %v2623_v14 = vpop.f32.mrb[37].mxu1  ;;  %v2641_v15 = vpop.f32.mrb[37].mxu0 }
 0x1a5   : > { %v1734_v17 = vadd.f32 %v1733_v10, %v1732_v9  ;;  %v3254_v18 = vpop.f32.mrb[38].mxu1  ;;  %v3256_v19 = vpop.f32.mrb[38].mxu0 }
 0x1a6   : > { %4075 = vst [vmem:[#allocation4_spill] sm:$0xff] %v3250_v13  ;;  %v1687_v20 = vmul.f32 %v3205_v47, %v3250_v13  ;;  %v720_v24 = vadd.f32 %v3254_v18, %v3174_v0  ;;  %v3263_v59 = vadd.f32 %v3256_v19, %v718_v57  ;;  %879 = vrot.lane.b32.xlu0 %v3256_v19, %s2816_s18  ;;  %v2624_v25 = vpop.f32.mrb[39].mxu1  ;;  %v2642_v29 = vpop.f32.mrb[39].mxu0 }
 0x1a7   : > { %v3308_v29 = vpop.permute.xlu0 %1667 }
 0x1a8   : > { %4076 = vst [vmem:[#allocation5_spill] sm:$0xff] %v3263_v59  ;;  %v1699_v32 = vsel %vm1695_vm3, %v1687_v20, 0.0  ;;  %v1724_v35 = vmul.f32 %v1687_v20, %v3250_v13  ;;  %v1688_v36 = vmul.f32 %v3237_v3, %v3263_v59 }
 0x1a9   : > { %v1700_v38 = vadd.f32 %v1699_v32, %v1698_v5  ;;  %v3310_v32 = vpop.permute.xlu1 %1672 }
 0x1aa   : > { %v1735_v41 = vsel %vm1695_vm3, %v1724_v35, 0.0  ;;  %v1701_v0 = vsel %vm1695_vm3, %v1688_v36, 0.0  ;;  %v1725_v43 = vmul.f32 %v1688_v36, %v3263_v59 }
 0x1ab   : > { %v1736_v50 = vadd.f32 %v1735_v41, %v1734_v17  ;;  %v1702_v44 = vadd.f32 %v1701_v0, %v1700_v38  ;;  %v3276_v52 = vpop.f32.mrb[40].mxu1  ;;  %v3278_v56 = vpop.f32.mrb[40].mxu0 }
 0x1ac   : > { %v1737_v57 = vsel %vm1695_vm3, %v1725_v43, 0.0  ;;  %v721_v58 = vadd.f32 %v3276_v52, %v3178_v6  ;;  %v3284_v60 = vadd.f32 %v3278_v56, %v719_v12  ;;  %881 = vrot.lane.b32.xlu0 %v3278_v56, %s2816_s18  ;;  %v2627_v61 = vpop.f32.mrb[41].mxu1  ;;  %v2645_v62 = vpop.f32.mrb[41].mxu0 }
 0x1ad   : > { %v1738_v63 = vadd.f32 %v1737_v57, %v1736_v50  ;;  %v3288_v1 = vpop.f32.mrb[42].mxu1  ;;  %v3290_v54 = vpop.f32.mrb[42].mxu0 }
 0x1ae   : > { %4077 = vst [vmem:[#allocation6_spill] sm:$0xff] %v3284_v60  ;;  %v1689_v5 = vmul.f32 %v3239_v4, %v3284_v60  ;;  %v722_v9 = vadd.f32 %v3288_v1, %v3182_v11  ;;  %v3297_v6 = vadd.f32 %v3290_v54, %v720_v24  ;;  %v2628_v10 = vpop.f32.mrb[43].mxu1  ;;  %v2646_v12 = vpop.f32.mrb[43].mxu0 }
 0x1b0   : > { %4078 = vst [vmem:[#allocation7_spill] sm:$0xff] %v3297_v6  ;;  %v1703_v14 = vsel %vm1695_vm3, %v1689_v5, 0.0  ;;  %v1726_v15 = vmul.f32 %v1689_v5, %v3284_v60  ;;  %v1690_v17 = vmul.f32 %v3274_v45, %v3297_v6  ;;  %883 = vrot.lane.b32.xlu0 %v3290_v54, %s2816_s18 }
 0x1b1   : > { %v1704_v20 = vadd.f32 %v1703_v14, %v1702_v44 }
 0x1b2   : > { %v1739_v25 = vsel %vm1695_vm3, %v1726_v15, 0.0  ;;  %v1705_v11 = vsel %vm1695_vm3, %v1690_v17, 0.0  ;;  %v1727_v24 = vmul.f32 %v1690_v17, %v3297_v6 }
 0x1b3   : > { %v1740_v35 = vadd.f32 %v1739_v25, %v1738_v63  ;;  %v1706_v36 = vadd.f32 %v1705_v11, %v1704_v20  ;;  %v3312_v38 = vpop.f32.mrb[44].mxu1  ;;  %v3314_v41 = vpop.f32.mrb[44].mxu0 }
 0x1b4   : > { %4079 = vst [vmem:[#allocation8_spill] sm:$0xff] %v3312_v38  ;;  %v1741_v0 = vsel %vm1695_vm3, %v1727_v24, 0.0  ;;  %v723_v43 = vadd.f32 %v3312_v38, %v3186_v16  ;;  %v3320_v50 = vadd.f32 %v3314_v41, %v721_v58  ;;  %885 = vrot.lane.b32.xlu1 %v3314_v41, %s2816_s18  ;;  %v2631_v44 = vpop.f32.mrb[45].mxu1  ;;  %v2649_v57 = vpop.f32.mrb[45].mxu0 }
 0x1b5   : > { %v1742_v61 = vadd.f32 %v1741_v0, %v1740_v35  ;;  %v3324_v62 = vpop.f32.mrb[46].mxu1  ;;  %v3326_v63 = vpop.f32.mrb[46].mxu0 }
 0x1b6   : > { %4080 = vst [vmem:[#allocation9_spill] sm:$0xff] %v3320_v50  ;;  %v1691_v5 = vmul.f32 %v3308_v29, %v3320_v50  ;;  %v724_v10 = vadd.f32 %v3324_v62, %v3190_v21  ;;  %v3333_v16 = vadd.f32 %v3326_v63, %v722_v9  ;;  %887 = vrot.lane.b32.xlu0 %v3326_v63, %s2816_s18  ;;  %v2632_v58 = vpop.f32.mrb[47].mxu1  ;;  %v2650_v12 = vpop.f32.mrb[47].mxu0 }
 0x1b7   : > { %v3344_v11 = vpop.permute.xlu0 %1677  ;;  %v3346_v24 = vpop.permute.xlu1 %1682 }
 0x1b8   : > { %4081 = vst [vmem:[#allocation10_spill] sm:$0xff] %v3333_v16  ;;  %v1707_v14 = vsel %vm1695_vm3, %v1691_v5, 0.0  ;;  %v1728_v15 = vmul.f32 %v1691_v5, %v3320_v50  ;;  %v1692_v17 = vmul.f32 %v3310_v32, %v3333_v16 }
 0x1b9   : > { %v1708_v20 = vadd.f32 %v1707_v14, %v1706_v36 }
 0x1ba   : > { %v1743_v25 = vsel %vm1695_vm3, %v1728_v15, 0.0  ;;  %v1709_v21 = vsel %vm1695_vm3, %v1692_v17, 0.0  ;;  %v1729_v9 = vmul.f32 %v1692_v17, %v3333_v16 }
 0x1bb   : > { %v1744_v35 = vadd.f32 %v1743_v25, %v1742_v61  ;;  %v1710_v0 = vadd.f32 %v1709_v21, %v1708_v20  ;;  %v3348_v44 = vpop.f32.mrb[48].mxu0  ;;  %v992_v57 = vpop.f32.mrb[48].mxu1 }
 0x1bc   : > { %v1745_v5 = vsel %vm1695_vm3, %v1729_v9, 0.0  ;;  %v3352_v58 = vadd.f32 %v3348_v44, %v723_v43  ;;  %889 = vrot.lane.b32.xlu1 %v3348_v44, %s2816_s18  ;;  %v2653_v36 = vpop.f32.mrb[49].mxu0  ;;  %1041 = vrot.lane.b32.xlu0 %v992_v57, %s2825_s29  ;;  %v2659_v12 = vpop.f32.mrb[49].mxu1 }
 0x1bd   : > { %v3357_v14 = vpop.f32.mrb[50].mxu0  ;;  %v995_v15 = vpop.f32.mrb[50].mxu1  ;;  %v1746_v61 = vadd.f32 %v1745_v5, %v1744_v35 }
 0x1be   : > { %4082 = vst [vmem:[#allocation11_spill] sm:$0xff] %v3352_v58  ;;  %v1693_v17 = vmul.f32 %v3344_v11, %v3352_v58  ;;  %v3362_v20 = vadd.f32 %v3357_v14, %v724_v10  ;;  %v2654_v25 = vpop.f32.mrb[51].mxu0  ;;  %v2660_v43 = vpop.f32.mrb[51].mxu1 }
 0x1c0   : > { %4083 = vst [vmem:[#allocation12_spill] sm:$0xff] %v3362_v20  ;;  %v1711_v21 = vsel %vm1695_vm3, %v1693_v17, 0.0  ;;  %v1730_v9 = vmul.f32 %v1693_v17, %v3352_v58  ;;  %v1694_v36 = vmul.f32 %v3346_v24, %v3362_v20  ;;  %1081 = vrot.lane.b32.xlu0 %v992_v57, %s2826_s30  ;;  %1043 = vrot.lane.b32.xlu1 %v995_v15, %s2825_s29 }
 0x1c1   : > { %v1712_v35 = vadd.f32 %v1711_v21, %v1710_v0 }
 0x1c2   : > { %v1731_v5 = vmul.f32 %v1694_v36, %v3362_v20  ;;  %v1713_v10 = vsel %vm1695_vm3, %v1694_v36, 0.0  ;;  %v1747_v12 = vsel %vm1695_vm3, %v1730_v9, 0.0 }
 0x1c3   : > { %v1000_v25 = vpop.f32.mrb[52].mxu1  ;;  %v1190_v43 = vpop.f32.mrb[52].mxu0  ;;  %v3373_v16 = vadd.f32 %v1713_v10, %v1712_v35  ;;  %v1748_v17 = vadd.f32 %v1747_v12, %v1746_v61 }
 0x1c4   : > { %891 = vrot.lane.b32.xlu0 %v3357_v14, %s2816_s18  ;;  %1083 = vrot.lane.b32.xlu1 %v995_v15, %s2826_s30  ;;  %v2663_v57 = vpop.f32.mrb[53].mxu1  ;;  %v2681_v58 = vpop.f32.mrb[53].mxu0  ;;  %v1749_v0 = vsel %vm1695_vm3, %v1731_v5, 0.0 }
 0x1c5   : > { %4084 = vst [vmem:[#allocation13_spill] sm:$0xff] %v3373_v16  ;;  %v1003_v21 = vpop.f32.mrb[54].mxu1  ;;  %v1193_v20 = vpop.f32.mrb[54].mxu0  ;;  %v3379_v50 = vadd.f32 %v1749_v0, %v1748_v17 }
 0x1c6   : > { %v2664_v36 = vpop.f32.mrb[55].mxu1  ;;  %v2682_v9 = vpop.f32.mrb[55].mxu0 }
 0x1c7   : > { %4085 = vst [vmem:[#allocation14_spill] sm:$0xff] %v3379_v50 }
 0x1c8   : > { %1239 = vrot.lane.b32.xlu0 %v1190_v43, %s2825_s29  ;;  %1045 = vrot.lane.b32.xlu1 %v1000_v25, %s2825_s29 }
 0x1cb   : > { %v1198_v61 = vpop.f32.mrb[56].mxu0  ;;  %v1008_v35 = vpop.f32.mrb[56].mxu1 }
 0x1cc   : > { %1085 = vrot.lane.b32.xlu0 %v1000_v25, %s2826_s30  ;;  %1241 = vrot.lane.b32.xlu1 %v1193_v20, %s2825_s29  ;;  %v2685_v15 = vpop.f32.mrb[57].mxu0  ;;  %v2667_v58 = vpop.f32.mrb[57].mxu1 }
 0x1cd   : > { %v1201_v10 = vpop.f32.mrb[58].mxu0  ;;  %v1011_v5 = vpop.f32.mrb[58].mxu1 }
 0x1ce   : > { %v2686_v12 = vpop.f32.mrb[59].mxu0  ;;  %v2668_v57 = vpop.f32.mrb[59].mxu1 }
 0x1d0   : > { %1087 = vrot.lane.b32.xlu0 %v1003_v21, %s2826_s30  ;;  %1047 = vrot.lane.b32.xlu1 %v1003_v21, %s2825_s29 }
 0x1d3   : > { %v1016_v17 = vpop.f32.mrb[60].mxu1  ;;  %v1206_v43 = vpop.f32.mrb[60].mxu0 }
 0x1d4   : > { %1243 = vrot.lane.b32.xlu1 %v1198_v61, %s2825_s29  ;;  %1089 = vrot.lane.b32.xlu0 %v1008_v35, %s2826_s30  ;;  %v2689_v0 = vpop.f32.mrb[61].mxu0  ;;  %v2671_v25 = vpop.f32.mrb[61].mxu1 }
 0x1d5   : > { %v1209_v36 = vpop.f32.mrb[62].mxu0  ;;  %v1019_v20 = vpop.f32.mrb[62].mxu1 }
 0x1d6   : > { %v2690_v9 = vpop.f32.mrb[63].mxu0  ;;  %v2672_v15 = vpop.f32.mrb[63].mxu1 }
 0x1d8   : > { %1049 = vrot.lane.b32.xlu1 %v1008_v35, %s2825_s29  ;;  %1051 = vrot.lane.b32.xlu0 %v1011_v5, %s2825_s29 }
 0x1db   : > { %v1024_v58 = vpop.f32.mrb[64].mxu1  ;;  %v1214_v12 = vpop.f32.mrb[64].mxu0 }
 0x1dc   : > { %1245 = vrot.lane.b32.xlu1 %v1201_v10, %s2825_s29  ;;  %1093 = vrot.lane.b32.xlu0 %v1016_v17, %s2826_s30  ;;  %v2693_v21 = vpop.f32.mrb[65].mxu0  ;;  %v2675_v61 = vpop.f32.mrb[65].mxu1 }
 0x1dd   : > { %v1217_v57 = vpop.f32.mrb[66].mxu0  ;;  %v1027_v6 = vpop.f32.mrb[66].mxu1 }
 0x1de   : > { %v2694_v0 = vpop.f32.mrb[67].mxu0  ;;  %v2676_v25 = vpop.f32.mrb[67].mxu1 }
 0x1e0   : > { %1091 = vrot.lane.b32.xlu1 %v1011_v5, %s2826_s30  ;;  %1249 = vrot.lane.b32.xlu0 %v1209_v36, %s2825_s29 }
 0x1e3   : > { %v1348_v9 = vpop.f32.mrb[68].mxu1  ;;  %v1222_v35 = vpop.f32.mrb[68].mxu0 }
 0x1e4   : > { %1247 = vrot.lane.b32.xlu1 %v1206_v43, %s2825_s29  ;;  %1055 = vrot.lane.b32.xlu0 %v1019_v20, %s2825_s29  ;;  %v2703_v15 = vpop.f32.mrb[69].mxu1  ;;  %v2697_v10 = vpop.f32.mrb[69].mxu0 }
 0x1e5   : > { %v3397_v60 = vpop.f32.mrb[70].mxu1  ;;  %v3399_v21 = vpop.f32.mrb[70].mxu0 }
 0x1e6   : > { %v568_v61 = vpop.permute.xlu1 %567  ;;  %v2704_v59 = vpop.f32.mrb[71].mxu1 }
 0x1e7   : > { %v597_v0 = vadd.f32 %v568_v61, %v3139_v22  ;;  %v2698_v25 = vpop.f32.mrb[71].mxu0 }
 0x1e8   : > { %v570_v5 = vpop.permute.xlu0 %569  ;;  %1053 = vrot.lane.b32.xlu1 %v1016_v17, %s2825_s29  ;;  %1097 = vrot.lane.b32.xlu0 %v1024_v58, %s2826_s30 }
 0x1e9   : > { %v598_v43 = vadd.f32 %v570_v5, %v3143_v26  ;;  %v3406_v36 = vadd.f32 %v3209_v39, %v597_v0 }
 0x1eb   : > { %v3408_v15 = vpop.f32.mrb[72].mxu1  ;;  %v1546_v10 = vpop.f32.mrb[72].mxu0  ;;  %v3411_v13 = vadd.f32 %v3220_v55, %v598_v43 }
 0x1ec   : > { %1095 = vrot.lane.b32.xlu1 %v1019_v20, %s2826_s30  ;;  %1253 = vrot.lane.b32.xlu0 %v1217_v57, %s2825_s29  ;;  %v2707_v22 = vpop.f32.mrb[73].mxu1  ;;  %v2725_v59 = vpop.f32.mrb[73].mxu0 }
 0x1ed   : > { %v3415_v17 = vpop.f32.mrb[74].mxu1  ;;  %v3417_v61 = vpop.f32.mrb[74].mxu0 }
 0x1ee   : > { %v572_v26 = vpop.permute.xlu0 %571  ;;  %v2708_v25 = vpop.f32.mrb[75].mxu1 }
 0x1ef   : > { %v599_v0 = vadd.f32 %v572_v26, %v3147_v30  ;;  %v2726_v5 = vpop.f32.mrb[75].mxu0 }
 0x1f0   : > { %1251 = vrot.lane.b32.xlu1 %v1214_v12, %s2825_s29  ;;  %1099 = vrot.lane.b32.xlu0 %v1027_v6, %s2826_s30 }
 0x1f1   : > { %v3423_v43 = vadd.f32 %v3243_v8, %v599_v0 }
 0x1f2   : > { %v574_v20 = vpop.permute.xlu0 %573 }
 0x1f3   : > { %v600_v57 = vadd.f32 %v574_v20, %v3151_v33  ;;  %v1554_v22 = vpop.f32.mrb[76].mxu0  ;;  %v3426_v59 = vpop.f32.mrb[76].mxu1 }
 0x1f4   : > { %1057 = vrot.lane.b32.xlu1 %v1024_v58, %s2825_s29  ;;  %1397 = vrot.lane.b32.xlu0 %v1348_v9, %s2825_s29  ;;  %v2711_v25 = vpop.f32.mrb[77].mxu1  ;;  %v2729_v30 = vpop.f32.mrb[77].mxu0 }
 0x1f5   : > { %v3430_v26 = vpop.f32.mrb[78].mxu1  ;;  %v1557_v12 = vpop.f32.mrb[78].mxu0  ;;  %v3433_v5 = vadd.f32 %v3256_v19, %v600_v57 }
 0x1f6   : > { %v576_v0 = vpop.permute.xlu1 %575  ;;  %v2730_v49 = vpop.f32.mrb[79].mxu0 }
 0x1f7   : > { %v601_v51 = vadd.f32 %v576_v0, %v3155_v37  ;;  %v2712_v33 = vpop.f32.mrb[79].mxu1 }
 0x1f8   : > { %1059 = vrot.lane.b32.xlu1 %v1027_v6, %s2825_s29  ;;  %1437 = vrot.lane.b32.xlu0 %v1348_v9, %s2826_s30 }
 0x1f9   : > { %v3439_v58 = vadd.f32 %v3278_v56, %v601_v51 }
 0x1fa   : > { %v578_v20 = vpop.permute.xlu1 %577 }
 0x1fb   : > { %v602_v25 = vadd.f32 %v578_v20, %v3158_v42  ;;  %v1562_v30 = vpop.f32.mrb[80].mxu0  ;;  %v1372_v50 = vpop.f32.mrb[80].mxu1 }
 0x1fc   : > { %1255 = vrot.lane.b32.xlu1 %v1222_v35, %s2825_s29  ;;  %1401 = vrot.lane.b32.xlu0 %v3408_v15, %s2825_s29  ;;  %v2715_v49 = vpop.f32.mrb[81].mxu1  ;;  %v2733_v37 = vpop.f32.mrb[81].mxu0 }
 0x1fd   : > { %v1375_v57 = vpop.f32.mrb[82].mxu1  ;;  %v1565_v0 = vpop.f32.mrb[82].mxu0  ;;  %v3446_v6 = vadd.f32 %v3290_v54, %v602_v25 }
 0x1fe   : > { %v580_v9 = vpop.permute.xlu1 %579  ;;  %v2734_v51 = vpop.f32.mrb[83].mxu0 }
 0x1ff   : > { %v603_v33 = vadd.f32 %v580_v9, %v3141_v23  ;;  %v2716_v16 = vpop.f32.mrb[83].mxu1 }
 0x200   : > { %v582_v42 = vpop.permute.xlu0 %581  ;;  %1399 = vrot.lane.b32.xlu1 %v3397_v60, %s2825_s29  ;;  %1595 = vrot.lane.b32.xlu0 %v1546_v10, %s2827_s4 }
 0x201   : > { %v604_v35 = vadd.f32 %v582_v42, %v3145_v27  ;;  %v3454_v20 = vadd.f32 %v3314_v41, %v603_v33 }
 0x203   : > { %v1570_v49 = vpop.f32.mrb[84].mxu0  ;;  %v1380_v25 = vpop.f32.mrb[84].mxu1  ;;  %v3457_v37 = vadd.f32 %v3326_v63, %v604_v35 }
 0x204   : > { %1439 = vrot.lane.b32.xlu1 %v3397_v60, %s2826_s30  ;;  %1403 = vrot.lane.b32.xlu0 %v3415_v17, %s2825_s29  ;;  %v2737_v23 = vpop.f32.mrb[85].mxu0  ;;  %v2719_v16 = vpop.f32.mrb[85].mxu1 }
 0x205   : > { %v1573_v9 = vpop.f32.mrb[86].mxu0  ;;  %v1383_v10 = vpop.f32.mrb[86].mxu1 }
 0x206   : > { %v584_v51 = vpop.permute.xlu1 %583  ;;  %v2738_v27 = vpop.f32.mrb[87].mxu0 }
 0x207   : > { %v605_v33 = vadd.f32 %v584_v51, %v3149_v2  ;;  %v2720_v42 = vpop.f32.mrb[87].mxu1 }
 0x208   : > { %v586_v38 = vpop.permute.xlu0 %585  ;;  %1257 = vrot.lane.b32.xlu1 %v3399_v21, %s2825_s29  ;;  %1599 = vrot.lane.b32.xlu0 %v1554_v22, %s2827_s4 }
 0x209   : > { %v606_v60 = vadd.f32 %v586_v38, %v3153_v34  ;;  %v3469_v35 = vadd.f32 %v3348_v44, %v605_v33 }
 0x20b   : > { %v1578_v23 = vpop.f32.mrb[88].mxu0  ;;  %v3472_v16 = vadd.f32 %v3357_v14, %v606_v60 }
 0x20c   : > { %1441 = vrot.lane.b32.xlu1 %v3408_v15, %s2826_s30  ;;  %1445 = vrot.lane.b32.xlu0 %v3426_v59, %s2826_s30  ;;  %v2741_v2 = vpop.f32.mrb[89].mxu0 }
 0x20d   : > { %v1581_v51 = vpop.f32.mrb[90].mxu0 }
 0x20e   : > { %v2742_v21 = vpop.f32.mrb[91].mxu0 }
 0x210   : > { %1597 = vrot.lane.b32.xlu1 %v3417_v61, %s2827_s4  ;;  %1407 = vrot.lane.b32.xlu0 %v3430_v26, %s2825_s29  ;;  %v876_v34 = vpop.permute.xlu0 %875 }
 0x211   : > { %v904_v2 = vadd.f32 %v876_v34, %v3199_v40 }
 0x214   : > { %1443 = vrot.lane.b32.xlu1 %v3415_v17, %s2826_s30  ;;  %1603 = vrot.lane.b32.xlu0 %v1562_v30, %s2827_s4  ;;  %v874_v17 = vpop.permute.xlu1 %873 }
 0x215   : > { %v903_v33 = vadd.f32 %v874_v17, %v3195_v31 }
 0x218   : > { %1405 = vrot.lane.b32.xlu1 %v3426_v59, %s2825_s29  ;;  %1449 = vrot.lane.b32.xlu0 %v1372_v50, %s2826_s30  ;;  %v880_v38 = vpop.permute.xlu0 %879  ;;  %v878_v61 = vpop.permute.xlu1 %877 }
 0x219   : > { %v905_v31 = vadd.f32 %v878_v61, %v3207_v48 }
 0x21c   : > { %1601 = vrot.lane.b32.xlu1 %v1557_v12, %s2827_s4  ;;  %1411 = vrot.lane.b32.xlu0 %v1375_v57, %s2825_s29 }
 0x21e   : > { %v882_v15 = vpop.permute.xlu0 %881 }
 0x220   : > { %1447 = vrot.lane.b32.xlu1 %v3430_v26, %s2826_s30  ;;  %1607 = vrot.lane.b32.xlu0 %v1570_v49, %s2827_s4 }
 0x222   : > { %v884_v22 = vpop.permute.xlu0 %883 }
 0x223   : > { %v908_v61 = vadd.f32 %v884_v22, %v3254_v18  ;;  %v907_v18 = vadd.f32 %v882_v15, %v3241_v7 }
 0x224   : > { %1409 = vrot.lane.b32.xlu1 %v1372_v50, %s2825_s29  ;;  %1413 = vrot.lane.b32.xlu0 %v1380_v25, %s2825_s29 }
 0x226   : > { %v3497_v59 = vpop.permute.xlu1 %885 }
 0x228   : > { %1605 = vrot.lane.b32.xlu1 %v1565_v0, %s2827_s4  ;;  %1609 = vrot.lane.b32.xlu0 %v1573_v9, %s2827_s4  ;;  %v3499_v12 = vpop.permute.xlu0 %887 }
 0x22c   : > { %1451 = vrot.lane.b32.xlu1 %v1375_v57, %s2826_s30  ;;  %1455 = vrot.lane.b32.xlu0 %v1383_v10, %s2826_s30 }
 0x22e   : > { %v3503_v26 = vpop.permute.xlu1 %889  ;;  %v1042_v30 = vpop.permute.xlu0 %1041 }
 0x230   : > { %1453 = vrot.lane.b32.xlu1 %v1380_v25, %s2826_s30  ;;  %1613 = vrot.lane.b32.xlu0 %v1581_v51, %s2827_s4 }
 0x232   : > { %v1082_v50 = vpop.permute.xlu0 %1081  ;;  %v1044_v49 = vpop.permute.xlu1 %1043 }
 0x233   : > { %v3508_v0 = vadd.f32 %v1082_v50, %v3209_v39 }
 0x234   : > { %1415 = vrot.lane.b32.xlu1 %v1383_v10, %s2825_s29 }
 0x236   : > { %v892_v9 = vpop.permute.xlu0 %891  ;;  %v3511_v27 = vpop.permute.xlu1 %1083 }
 0x237   : > { %v3514_v57 = vadd.f32 %v892_v9, %v3324_v62 }
 0x238   : > { %1611 = vrot.lane.b32.xlu1 %v1578_v23, %s2827_s4 }
 0x23a   : > { %v1240_v25 = vpop.permute.xlu0 %1239  ;;  %v1046_v42 = vpop.permute.xlu1 %1045 }
 0x23b   : > { %v3518_v60 = vadd.f32 %v1240_v25, %v903_v33 }
 0x23e   : > { %v1086_v39 = vpop.permute.xlu0 %1085  ;;  %v1242_v51 = vpop.permute.xlu1 %1241 }
 0x23f   : > { %v3522_v10 = vadd.f32 %v1086_v39, %v3243_v8  ;;  %v3524_v21 = vadd.f32 %v1242_v51, %v904_v2  ;;  %v906_v8 = vadd.f32 %v880_v38, %v3218_v53  ;;  %v3537_v51 = vadd.f32 %v1044_v49, %v3411_v13 }
 0x241   : > { %4086 = vst [vmem:[#allocation15_spill] sm:$0xff] %v3537_v51  ;;  %v1759_v38 = vmul.f32 %v3193_v28, %v3537_v51 }
 0x242   : > { %v1088_v50 = vpop.permute.xlu0 %1087  ;;  %v1048_v62 = vpop.permute.xlu1 %1047 }
 0x243   : > { %v3527_v9 = vadd.f32 %v1088_v50, %v3256_v19  ;;  %v3546_v50 = vadd.f32 %v1042_v30, %v3406_v36  ;;  %v1770_v15 = vsel %vm1768_vm4, %v1759_v38, 0.0 }
 0x245   : > { %4087 = vst [vmem:[#allocation16_spill] sm:$0xff] %v3546_v50  ;;  %v1758_v36 = vmul.f32 %v3203_v46, %v3546_v50 }
 0x246   : > { %v1244_v23 = vpop.permute.xlu1 %1243  ;;  %v1090_v17 = vpop.permute.xlu0 %1089 }
 0x247   : > { %v3530_v33 = vadd.f32 %v1244_v23, %v905_v31  ;;  %v3533_v40 = vadd.f32 %v1090_v17, %v3278_v56  ;;  %v3549_v56 = vadd.f32 %v1046_v42, %v3423_v43  ;;  %v1799_v7 = vmul.f32 %v1758_v36, %v3546_v50 }
 0x249   : > { %4088 = vst [vmem:[#allocation17_spill] sm:$0xff] %v3549_v56  ;;  %v1760_v43 = vmul.f32 %v3205_v47, %v3549_v56 }
 0x24a   : > { %v1050_v34 = vpop.permute.xlu1 %1049  ;;  %v1052_v25 = vpop.permute.xlu0 %1051 }
 0x24b   : > { %v3567_v22 = vadd.f32 %v1050_v34, %v3439_v58 }
 0x24d   : > { %4090 = vst [vmem:[#allocation19_spill] sm:$0xff] %v3567_v22  ;;  %v1762_v58 = vmul.f32 %v3239_v4, %v3567_v22 }
 0x24e   : > { %v1246_v2 = vpop.permute.xlu1 %1245  ;;  %v1094_v39 = vpop.permute.xlu0 %1093 }
 0x24f   : > { %v3539_v19 = vadd.f32 %v1246_v2, %v906_v8  ;;  %v3542_v48 = vadd.f32 %v1094_v39, %v3314_v41  ;;  %v3559_v41 = vadd.f32 %v1048_v62, %v3433_v5  ;;  %v1801_v62 = vmul.f32 %v1760_v43, %v3549_v56 }
 0x250   : > { %v1769_v8 = vsel %vm1768_vm4, %v1758_v36, 0.0 }
 0x251   : > { %4089 = vst [vmem:[#allocation18_spill] sm:$0xff] %v3559_v41  ;;  %v1761_v5 = vmul.f32 %v3237_v3, %v3559_v41  ;;  %v1812_v36 = vsel %vm1768_vm4, %v1801_v62, 0.0 }
 0x252   : > { %v1092_v31 = vpop.permute.xlu1 %1091  ;;  %v1250_v53 = vpop.permute.xlu0 %1249 }
 0x253   : > { %v3554_v13 = vadd.f32 %v1092_v31, %v3290_v54  ;;  %v3556_v49 = vadd.f32 %v1250_v53, %v908_v61  ;;  %v1800_v54 = vmul.f32 %v1759_v38, %v3537_v51  ;;  %v1772_v61 = vsel %vm1768_vm4, %v1760_v43, 0.0 }
 0x254   : > { %v1802_v31 = vmul.f32 %v1761_v5, %v3559_v41  ;;  %v3587_v53 = vadd.f32 %v1052_v25, %v3446_v6  ;;  %v1776_v25 = vsel %vm1768_vm4, %v1762_v58, 0.0 }
 0x255   : > { %v1810_v2 = vsel %vm1768_vm4, %v1800_v54, 0.0  ;;  %v1774_v54 = vsel %vm1768_vm4, %v1761_v5, 0.0 }
 0x256   : > { %v1248_v30 = vpop.permute.xlu1 %1247  ;;  %v1056_v42 = vpop.permute.xlu0 %1055  ;;  %4091 = vst [vmem:[#allocation20_spill] sm:$0xff] %v3587_v53 }
 0x257   : > { %v3570_v23 = vadd.f32 %v1248_v30, %v907_v18  ;;  %v1771_v18 = vadd.f32 %v1770_v15, %v1769_v8  ;;  %v1809_v30 = vsel %vm1768_vm4, %v1799_v7, 0.0  ;;  %v1763_v7 = vmul.f32 %v3274_v45, %v3587_v53 }
 0x258   : > { %v1811_v43 = vadd.f32 %v1810_v2, %v1809_v30  ;;  %v3609_v8 = vadd.f32 %v1056_v42, %v3457_v37 }
 0x259   : > { %v1773_v41 = vadd.f32 %v1772_v61, %v1771_v18 }
 0x25a   : > { %v1054_v17 = vpop.permute.xlu1 %1053  ;;  %v1098_v34 = vpop.permute.xlu0 %1097  ;;  %v1813_v15 = vadd.f32 %v1812_v36, %v1811_v43  ;;  %4093 = vst [vmem:[#allocation22_spill] sm:$0xff] %v3609_v8 }
 0x25b   : > { %v3582_v39 = vadd.f32 %v1098_v34, %v3348_v44  ;;  %v3590_v38 = vadd.f32 %v1054_v17, %v3454_v20  ;;  %v1803_v44 = vmul.f32 %v1762_v58, %v3567_v22  ;;  %v1814_v20 = vsel %vm1768_vm4, %v1802_v31, 0.0 }
 0x25c   : > { %v1775_v62 = vadd.f32 %v1774_v54, %v1773_v41  ;;  %v1815_v61 = vadd.f32 %v1814_v20, %v1813_v15  ;;  %v1804_v58 = vmul.f32 %v1763_v7, %v3587_v53  ;;  %v1765_v41 = vmul.f32 %v3310_v32, %v3609_v8 }
 0x25d   : > { %4092 = vst [vmem:[#allocation21_spill] sm:$0xff] %v3590_v38  ;;  %v1764_v5 = vmul.f32 %v3308_v29, %v3590_v38  ;;  %v1816_v17 = vsel %vm1768_vm4, %v1803_v44, 0.0 }
 0x25e   : > { %v1096_v34 = vpop.permute.xlu1 %1095  ;;  %v3596_v56 = vpop.permute.xlu0 %1253  ;;  %v1777_v31 = vadd.f32 %v1776_v25, %v1775_v62  ;;  %v1817_v30 = vadd.f32 %v1816_v17, %v1815_v61  ;;  %v1818_v43 = vsel %vm1768_vm4, %v1804_v58, 0.0  ;;  %v1806_v62 = vmul.f32 %v1765_v41, %v3609_v8 }
 0x25f   : > { %v3599_v6 = vadd.f32 %v1096_v34, %v3326_v63  ;;  %v1805_v18 = vmul.f32 %v1764_v5, %v3590_v38  ;;  %v1778_v34 = vsel %vm1768_vm4, %v1763_v7, 0.0  ;;  %v1780_v36 = vsel %vm1768_vm4, %v1764_v5, 0.0 }
 0x260   : > { %v1779_v54 = vadd.f32 %v1778_v34, %v1777_v31  ;;  %v1819_v25 = vadd.f32 %v1818_v43, %v1817_v30  ;;  %v1782_v31 = vsel %vm1768_vm4, %v1765_v41, 0.0  ;;  %v1822_v30 = vsel %vm1768_vm4, %v1806_v62, 0.0 }
 0x261   : > { %v1820_v20 = vsel %vm1768_vm4, %v1805_v18, 0.0 }
 0x262   : > { %v3611_v2 = vpop.permute.xlu1 %1251  ;;  %v3613_v63 = vpop.permute.xlu0 %1099  ;;  %v1781_v15 = vadd.f32 %v1780_v36, %v1779_v54  ;;  %v1821_v5 = vadd.f32 %v1820_v20, %v1819_v25 }
 0x264   : > { %v1783_v18 = vadd.f32 %v1782_v31, %v1781_v15  ;;  %v1823_v43 = vadd.f32 %v1822_v30, %v1821_v5 }
 0x266   : > { %v1058_v37 = vpop.permute.xlu1 %1057  ;;  %v1398_v42 = vpop.permute.xlu0 %1397 }
 0x267   : > { %v3622_v44 = vadd.f32 %v1058_v37, %v3469_v35 }
 0x269   : > { %4094 = vst [vmem:[#allocation23_spill] sm:$0xff] %v3622_v44  ;;  %v1766_v7 = vmul.f32 %v3344_v11, %v3622_v44 }
 0x26a   : > { %v1060_v17 = vpop.permute.xlu1 %1059  ;;  %v1438_v61 = vpop.permute.xlu0 %1437 }
 0x26b   : > { %v1807_v38 = vmul.f32 %v1766_v7, %v3622_v44  ;;  %v1784_v35 = vsel %vm1768_vm4, %v1766_v7, 0.0  ;;  %v3633_v58 = vadd.f32 %v1060_v17, %v3472_v16 }
 0x26c   : > { %v1785_v20 = vadd.f32 %v1784_v35, %v1783_v18 }
 0x26d   : > { %v1824_v34 = vsel %vm1768_vm4, %v1807_v38, 0.0  ;;  %v1767_v36 = vmul.f32 %v3346_v24, %v3633_v58 }
 0x26e   : > { %v3639_v37 = vpop.permute.xlu1 %1255  ;;  %v1402_v54 = vpop.permute.xlu0 %1401  ;;  %v1825_v7 = vadd.f32 %v1824_v34, %v1823_v43 }
 0x26f   : > { %v1786_v41 = vsel %vm1768_vm4, %v1767_v36, 0.0  ;;  %v1808_v25 = vmul.f32 %v1767_v36, %v3633_v58 }
 0x270   : > { %v1787_v16 = vadd.f32 %v1786_v41, %v1785_v20 }
 0x271   : > { %v1826_v15 = vsel %vm1768_vm4, %v1808_v25, 0.0 }
 0x272   : > { %v1400_v17 = vpop.permute.xlu1 %1399  ;;  %v1596_v62 = vpop.permute.xlu0 %1595  ;;  %v1788_v31 = vrot.slane %v1787_v16, 4  ;;  %v1827_v38 = vadd.f32 %v1826_v15, %v1825_v7 }
 0x274   : > { %v1789_v44 = vadd.f32 %v1788_v31, %v1787_v16  ;;  %v1828_v8 = vrot.slane %v1827_v38, 4 }
 0x276   : > { %v1440_v22 = vpop.permute.xlu1 %1439  ;;  %v1404_v53 = vpop.permute.xlu0 %1403  ;;  %v1829_v50 = vadd.f32 %v1828_v8, %v1827_v38  ;;  %v1790_v51 = vrot.slane %v1789_v44, 2  ;;  %v1112_v38 = vadd.f32 %v3511_v27, %v3220_v55 }
 0x278   : > { %v1791_v5 = vadd.f32 %v1790_v51, %v1789_v44  ;;  %v1830_v35 = vrot.slane %v1829_v50, 2  ;;  %v3651_v51 = vadd.f32 %v1400_v17, %v3524_v21  ;;  %v3654_v44 = vadd.f32 %v1398_v42, %v3518_v60 }
 0x279   : > { %v3666_v21 = vadd.f32 %v1402_v54, %v3530_v33  ;;  %v1468_v60 = vadd.f32 %v1440_v22, %v1112_v38  ;;  %v910_v22 = vadd.f32 %v3499_v12, %v3288_v1  ;;  %v909_v1 = vadd.f32 %v3497_v59, %v3276_v52 }
 0x27a   : > { %v3644_v18 = vpop.permute.xlu1 %1257  ;;  %v1600_v30 = vpop.permute.xlu0 %1599  ;;  %v1792_v36 = vrot.slane %v1791_v5, 1  ;;  %v1831_v34 = vadd.f32 %v1830_v35, %v1829_v50  ;;  %v1840_v31 = vmul.f32 %v3193_v28, %v3651_v51  ;;  %v1839_v35 = vmul.f32 %v3203_v46, %v3654_v44 }
 0x27b   : > { %v1841_v33 = vmul.f32 %v3205_v47, %v3666_v21  ;;  %v1276_v38 = vadd.f32 %v3596_v56, %v910_v22 }
 0x27c   : > { %v1793_v41 = vadd.f32 %v1792_v36, %v1791_v5  ;;  %v1832_v25 = vrot.slane %v1831_v34, 1  ;;  %v1467_v5 = vadd.f32 %v1438_v61, %v3508_v0  ;;  %v1879_v27 = vmul.f32 %v1839_v35, %v3654_v44 }
 0x27d   : > { %v1850_v61 = vsel %vm1768_vm4, %v1840_v31, 0.0  ;;  %v1849_v54 = vsel %vm1768_vm4, %v1839_v35, 0.0 }
 0x27e   : > { %v1442_v43 = vpop.permute.xlu1 %1441  ;;  %v3646_v20 = vpop.permute.xlu0 %1445  ;;  %1795 = vrot.lane.b32.xlu1 %v1793_v41, %s2816_s18  ;;  %v1833_v7 = vadd.f32 %v1832_v25, %v1831_v34  ;;  %v3668_v17 = vadd.f32 %v1596_v62, %v1467_v5  ;;  %v1880_v34 = vmul.f32 %v1840_v31, %v3651_v51  ;;  %v3674_v41 = vadd.f32 %v1404_v53, %v3539_v19 }
 0x27f   : > { %v1469_v55 = vadd.f32 %v1442_v43, %v3522_v10  ;;  %v1851_v12 = vadd.f32 %v1850_v61, %v1849_v54  ;;  %v1889_v5 = vsel %vm1768_vm4, %v1879_v27, 0.0 }
 0x280   : > { %1835 = vrot.lane.b32.xlu0 %v1833_v7, %s2816_s18  ;;  %v1919_v19 = vmul.f32 %v3203_v46, %v3668_v17  ;;  %v1890_v10 = vsel %vm1768_vm4, %v1880_v34, 0.0  ;;  %v1842_v43 = vmul.f32 %v3237_v3, %v3674_v41 }
 0x281   : > { %v3691_v25 = vadd.f32 %v1600_v30, %v1469_v55  ;;  %v1881_v30 = vmul.f32 %v1841_v33, %v3666_v21  ;;  %v1891_v35 = vadd.f32 %v1890_v10, %v1889_v5  ;;  %v1275_v55 = vadd.f32 %v3611_v2, %v909_v1 }
 0x282   : > { %v1598_v16 = vpop.permute.xlu1 %1597  ;;  %v1408_v8 = vpop.permute.xlu0 %1407  ;;  %v1930_v61 = vsel %vm1929_vm5, %v1919_v19, 0.0  ;;  %v1854_v22 = vsel %vm1768_vm4, %v1842_v43, 0.0 }
 0x283   : > { %v3677_v0 = vadd.f32 %v1598_v16, %v1468_v60  ;;  %v4095_v16 = vld [vmem:[#allocation8_spill] sm:$0xff]  ;;  %v1960_v60 = vmul.f32 %v1919_v19, %v3668_v17  ;;  %v3708_v52 = vadd.f32 %v1408_v8, %v3556_v49  ;;  %v1892_v8 = vsel %vm1768_vm4, %v1881_v30, 0.0 }
 0x284   : > { %v911_v31 = vadd.f32 %v3503_v26, %v4095_v16  ;;  %v1921_v26 = vmul.f32 %v3205_v47, %v3691_v25 }
 0x285   : > { %v1920_v46 = vmul.f32 %v3193_v28, %v3677_v0  ;;  %v1882_v28 = vmul.f32 %v1842_v43, %v3674_v41  ;;  %v1970_v47 = vsel %vm1929_vm5, %v1960_v60, 0.0  ;;  %v1844_v2 = vmul.f32 %v3274_v45, %v3708_v52 }
 0x286   : > { %v1444_v15 = vpop.permute.xlu1 %1443  ;;  %v3656_v50 = vpop.permute.xlu0 %1603  ;;  %v1277_v27 = vadd.f32 %v3639_v37, %v911_v31  ;;  %v1933_v60 = vsel %vm1929_vm5, %v1921_v26, 0.0 }
 0x287   : > { %v1470_v56 = vadd.f32 %v1444_v15, %v3527_v9  ;;  %v1961_v49 = vmul.f32 %v1920_v46, %v3677_v0  ;;  %v1893_v9 = vadd.f32 %v1892_v8, %v1891_v35  ;;  %v1471_v15 = vadd.f32 %v3646_v20, %v3533_v40 }
 0x288   : > { %v1894_v1 = vsel %vm1768_vm4, %v1882_v28, 0.0  ;;  %v1931_v16 = vsel %vm1929_vm5, %v1920_v46, 0.0  ;;  %v1884_v46 = vmul.f32 %v1844_v2, %v3708_v52 }
 0x289   : > { %v1971_v31 = vsel %vm1929_vm5, %v1961_v49, 0.0  ;;  %v3737_v40 = vadd.f32 %v3656_v50, %v1471_v15  ;;  %v1895_v35 = vadd.f32 %v1894_v1, %v1893_v9 }
 0x28a   : > { %v1406_v42 = vpop.permute.xlu1 %1405  ;;  %v3670_v36 = vpop.permute.xlu0 %1449 }
 0x28b   : > { %v3694_v7 = vadd.f32 %v1406_v42, %v3570_v23  ;;  %v1852_v23 = vsel %vm1768_vm4, %v1841_v33, 0.0 }
 0x28c   : > { %v1853_v33 = vadd.f32 %v1852_v23, %v1851_v12  ;;  %v1962_v12 = vmul.f32 %v1921_v26, %v3691_v25  ;;  %v1473_v26 = vadd.f32 %v3670_v36, %v3542_v48 }
 0x28d   : > { %v1843_v34 = vmul.f32 %v3239_v4, %v3694_v7 }
 0x28e   : > { %v1602_v53 = vpop.permute.xlu1 %1601  ;;  %v1412_v62 = vpop.permute.xlu0 %1411 }
 0x28f   : > { %v3722_v54 = vadd.f32 %v1602_v53, %v1470_v56  ;;  %v1883_v19 = vmul.f32 %v1843_v34, %v3694_v7  ;;  %v1855_v53 = vadd.f32 %v1854_v22, %v1853_v33  ;;  %v1856_v20 = vsel %vm1768_vm4, %v1843_v34, 0.0 }
 0x290   : > { %v3742_v30 = vadd.f32 %v1412_v62, %v1276_v38  ;;  %v1932_v34 = vadd.f32 %v1931_v16, %v1930_v61  ;;  %v1858_v33 = vsel %vm1768_vm4, %v1844_v2, 0.0  ;;  %v1972_v62 = vadd.f32 %v1971_v31, %v1970_v47 }
 0x291   : > { %v1922_v5 = vmul.f32 %v3237_v3, %v3722_v54  ;;  %v1896_v3 = vsel %vm1768_vm4, %v1883_v19, 0.0  ;;  %v1923_v38 = vmul.f32 %v3239_v4, %v3737_v40  ;;  %v1857_v49 = vadd.f32 %v1856_v20, %v1855_v53 }
 0x292   : > { %v1448_v59 = vpop.permute.xlu1 %1447  ;;  %v1608_v42 = vpop.permute.xlu0 %1607  ;;  %v1898_v22 = vsel %vm1768_vm4, %v1884_v46, 0.0  ;;  %v1897_v9 = vadd.f32 %v1896_v3, %v1895_v35  ;;  %v1934_v19 = vadd.f32 %v1933_v60, %v1932_v34  ;;  %v1120_v35 = vadd.f32 %v3613_v63, %v3357_v14 }
 0x293   : > { %v1472_v28 = vadd.f32 %v1448_v59, %v3554_v13  ;;  %v1963_v13 = vmul.f32 %v1922_v5, %v3722_v54  ;;  %v1846_v59 = vmul.f32 %v3310_v32, %v3742_v30  ;;  %v1935_v47 = vsel %vm1929_vm5, %v1922_v5, 0.0 }
 0x294   : > { %v1859_v16 = vadd.f32 %v1858_v33, %v1857_v49  ;;  %v1936_v20 = vadd.f32 %v1935_v47, %v1934_v19  ;;  %v1899_v5 = vadd.f32 %v1898_v22, %v1897_v9  ;;  %v1278_v60 = vadd.f32 %v3644_v18, %v3514_v57 }
 0x295   : > { %v1975_v31 = vsel %vm1929_vm5, %v1963_v13, 0.0  ;;  %v1862_v3 = vsel %vm1768_vm4, %v1846_v59, 0.0 }
 0x296   : > { %v1410_v37 = vpop.permute.xlu1 %1409  ;;  %v1414_v10 = vpop.permute.xlu0 %1413 }
 0x297   : > { %v3732_v43 = vadd.f32 %v1410_v37, %v1275_v55  ;;  %v1973_v55 = vsel %vm1929_vm5, %v1962_v12, 0.0  ;;  %v3764_v15 = vadd.f32 %v1414_v10, %v1277_v27  ;;  %v3766_v37 = vadd.f32 %v1608_v42, %v1473_v26 }
 0x298   : > { %v1964_v12 = vmul.f32 %v1923_v38, %v3737_v40  ;;  %v1974_v53 = vadd.f32 %v1973_v55, %v1972_v62  ;;  %v1886_v27 = vmul.f32 %v1846_v59, %v3742_v30 }
 0x299   : > { %v1845_v23 = vmul.f32 %v3308_v29, %v3732_v43  ;;  %v1925_v46 = vmul.f32 %v3308_v29, %v3766_v37 }
 0x29a   : > { %v1606_v56 = vpop.permute.xlu1 %1605  ;;  %v1610_v50 = vpop.permute.xlu0 %1609  ;;  %v1976_v55 = vadd.f32 %v1975_v31, %v1974_v53  ;;  %v1902_v63 = vsel %vm1768_vm4, %v1886_v27, 0.0 }
 0x29b   : > { %v3754_v8 = vadd.f32 %v1606_v56, %v1472_v28  ;;  %v1885_v61 = vmul.f32 %v1845_v23, %v3732_v43  ;;  %v1860_v48 = vsel %vm1768_vm4, %v1845_v23, 0.0  ;;  %v1937_v56 = vsel %vm1929_vm5, %v1923_v38, 0.0 }
 0x29c   : > { %v1861_v23 = vadd.f32 %v1860_v48, %v1859_v16  ;;  %v1938_v49 = vadd.f32 %v1937_v56, %v1936_v20  ;;  %v1941_v26 = vsel %vm1929_vm5, %v1925_v46, 0.0  ;;  %v1966_v22 = vmul.f32 %v1925_v46, %v3766_v37 }
 0x29d   : > { %v1924_v36 = vmul.f32 %v3274_v45, %v3754_v8  ;;  %v1900_v10 = vsel %vm1768_vm4, %v1885_v61, 0.0  ;;  %v1847_v45 = vmul.f32 %v3344_v11, %v3764_v15 }
 0x29e   : > { %v1452_v4 = vpop.permute.xlu1 %1451  ;;  %v1456_v2 = vpop.permute.xlu0 %1455  ;;  %v1901_v34 = vadd.f32 %v1900_v10, %v1899_v5  ;;  %v1863_v29 = vadd.f32 %v1862_v3, %v1861_v23 }
 0x29f   : > { %v1474_v1 = vadd.f32 %v1452_v4, %v3599_v6  ;;  %v1965_v28 = vmul.f32 %v1924_v36, %v3754_v8  ;;  %v1939_v62 = vsel %vm1929_vm5, %v1924_v36, 0.0  ;;  %v1476_v57 = vadd.f32 %v1456_v2, %v1120_v35 }
 0x2a0   : > { %v1887_v18 = vmul.f32 %v1847_v45, %v3764_v15  ;;  %v1903_v9 = vadd.f32 %v1902_v63, %v1901_v34  ;;  %v1940_v47 = vadd.f32 %v1939_v62, %v1938_v49  ;;  %v1864_v4 = vsel %vm1768_vm4, %v1847_v45, 0.0 }
 0x2a1   : > { %v3776_v42 = vadd.f32 %v1610_v50, %v1474_v1  ;;  %v1977_v50 = vsel %vm1929_vm5, %v1964_v12, 0.0  ;;  %v1979_v13 = vsel %vm1929_vm5, %v1965_v28, 0.0  ;;  %v1865_v1 = vadd.f32 %v1864_v4, %v1863_v29 }
 0x2a2   : > { %v1454_v6 = vpop.permute.xlu1 %1453  ;;  %v1614_v33 = vpop.permute.xlu0 %1613  ;;  %v1904_v12 = vsel %vm1768_vm4, %v1887_v18, 0.0  ;;  %v1942_v5 = vadd.f32 %v1941_v26, %v1940_v47  ;;  %v1981_v45 = vsel %vm1929_vm5, %v1966_v22, 0.0 }
 0x2a3   : > { %v1926_v14 = vmul.f32 %v3310_v32, %v3776_v42  ;;  %v3797_v61 = vadd.f32 %v1614_v33, %v1476_v57  ;;  %v1978_v32 = vadd.f32 %v1977_v50, %v1976_v55  ;;  %v1475_v48 = vadd.f32 %v1454_v6, %v3582_v39 }
 0x2a4   : > { %v1905_v39 = vadd.f32 %v1904_v12, %v1903_v9 }
 0x2a5   : > { %v1967_v2 = vmul.f32 %v1926_v14, %v3776_v42  ;;  %v1980_v19 = vadd.f32 %v1979_v13, %v1978_v32  ;;  %v1943_v53 = vsel %vm1929_vm5, %v1926_v14, 0.0  ;;  %v1928_v31 = vmul.f32 %v3346_v24, %v3797_v61 }
 0x2a6   : > { %v1416_v38 = vpop.permute.xlu1 %1415  ;;  %v1944_v56 = vadd.f32 %v1943_v53, %v1942_v5 }
 0x2a7   : > { %v3799_v59 = vadd.f32 %v1416_v38, %v1278_v60  ;;  %v1983_v6 = vsel %vm1929_vm5, %v1967_v2, 0.0  ;;  %v1982_v46 = vadd.f32 %v1981_v45, %v1980_v19  ;;  %v1969_v50 = vmul.f32 %v1928_v31, %v3797_v61 }
 0x2a8   : > { %v1947_v57 = vsel %vm1929_vm5, %v1928_v31, 0.0 }
 0x2a9   : > { %v1848_v36 = vmul.f32 %v3346_v24, %v3799_v59  ;;  %v1984_v62 = vadd.f32 %v1983_v6, %v1982_v46  ;;  %v1987_v38 = vsel %vm1929_vm5, %v1969_v50, 0.0  ;;  %v4097_v6 = vld [vmem:[#allocation14_spill] sm:$0xff] }
 0x2aa   : > { %v1612_v16 = vpop.permute.xlu1 %1611 }
 0x2ab   : > { %v1866_v27 = vsel %vm1768_vm4, %v1848_v36, 0.0  ;;  %v1888_v10 = vmul.f32 %v1848_v36, %v3799_v59  ;;  %v3813_v20 = vadd.f32 %v1612_v16, %v1475_v48 }
 0x2ac   : > { %v1867_v23 = vadd.f32 %v1866_v27, %v1865_v1 }
 0x2ad   : > { %v1906_v35 = vsel %vm1768_vm4, %v1888_v10, 0.0  ;;  %v1927_v60 = vmul.f32 %v3344_v11, %v3813_v20 }
 0x2ae   : > { %v1868_v24 = vrot.slane %v1867_v23, 4  ;;  %v1907_v28 = vadd.f32 %v1906_v35, %v1905_v39  ;;  %v1751_v35 = vrot.slane %v4097_v6, 4 }
 0x2af   : > { %v1945_v55 = vsel %vm1929_vm5, %v1927_v60, 0.0  ;;  %v1968_v34 = vmul.f32 %v1927_v60, %v3813_v20 }
 0x2b0   : > { %v1869_v33 = vadd.f32 %v1868_v24, %v1867_v23  ;;  %v1908_v3 = vrot.slane %v1907_v28, 4  ;;  %v1946_v14 = vadd.f32 %v1945_v55, %v1944_v56  ;;  %v4096_v23 = vld [vmem:[#allocation13_spill] sm:$0xff]  ;;  %v1752_v46 = vadd.f32 %v1751_v35, %v4097_v6 }
 0x2b1   : > { %v1985_v63 = vsel %vm1929_vm5, %v1968_v34, 0.0  ;;  %v1715_v45 = vrot.slane %v4096_v23, 4  ;;  %v4104_v6 = vld [vmem:[#allocation9_spill] sm:$0xff] }
 0x2b2   : > { %v1909_v29 = vadd.f32 %v1908_v3, %v1907_v28  ;;  %v1948_v11 = vadd.f32 %v1947_v57, %v1946_v14  ;;  %v1986_v18 = vadd.f32 %v1985_v63, %v1984_v62  ;;  %v1870_v49 = vrot.slane %v1869_v33, 2 }
 0x2b3   : > { %v1716_v60 = vadd.f32 %v1715_v45, %v4096_v23  ;;  %v1753_v28 = vrot.slane %v1752_v46, 2  ;;  %v2007_v3 = vlaneseq  ;;  %v4103_v23 = vld [vmem:[#allocation7_spill] sm:$0xff] }
 0x2b4   : > { %v1949_v26 = vrot.slane %v1948_v11, 4  ;;  %v1988_v13 = vadd.f32 %v1987_v38, %v1986_v18  ;;  %v1871_v22 = vadd.f32 %v1870_v49, %v1869_v33  ;;  %v1910_v9 = vrot.slane %v1909_v29, 2 }
 0x2b5   : > { %v1717_v24 = vrot.slane %v1716_v60, 2  ;;  %v1754_v50 = vadd.f32 %v1753_v28, %v1752_v46 }
 0x2b6   : > { %v1989_v32 = vrot.slane %v1988_v13, 4  ;;  %v1872_v47 = vrot.slane %v1871_v22, 1  ;;  %v1911_v4 = vadd.f32 %v1910_v9, %v1909_v29  ;;  %v1950_v2 = vadd.f32 %v1949_v26, %v1948_v11 }
 0x2b7   : > { %v1718_v56 = vadd.f32 %v1717_v24, %v1716_v60  ;;  %v1755_v33 = vrot.slane %v1754_v50, 1  ;;  %v2008_v11 = vshrl.u32 %v2007_v3, 7  ;;  %v4105_v60 = vld [vmem:[#allocation10_spill] sm:$0xff]  ;;  %v4106_v24 = vld [vmem:[#allocation11_spill] sm:$0xff] }
 0x2b8   : > { %v1873_v48 = vadd.f32 %v1872_v47, %v1871_v22  ;;  %v1912_v36 = vrot.slane %v1911_v4, 1  ;;  %v1951_v1 = vrot.slane %v1950_v2, 2  ;;  %v1990_v12 = vadd.f32 %v1989_v32, %v1988_v13 }
 0x2b9   : > { %v1719_v55 = vrot.slane %v1718_v56, 1  ;;  %v1756_v29 = vadd.f32 %v1755_v33, %v1754_v50  ;;  %v2009_v22 = vsub.s32 0, %v2008_v11 }
 0x2ba   : > { %1875 = vrot.lane.b32.xlu1 %v1873_v48, %s2816_s18  ;;  %v1913_v19 = vadd.f32 %v1912_v36, %v1911_v4  ;;  %v1952_v53 = vadd.f32 %v1951_v1, %v1950_v2  ;;  %v1991_v16 = vrot.slane %v1990_v12, 2  ;;  %v4098_v1 = vld [vmem:[#allocation2_spill] sm:$0xff] }
 0x2bb   : > { %v1720_v14 = vadd.f32 %v1719_v55, %v1718_v56  ;;  %v4107_v56 = vld [vmem:[#allocation12_spill] sm:$0xff] }
 0x2bc   : > { %1915 = vrot.lane.b32.xlu0 %v1913_v19, %s2816_s18  ;;  %v1953_v31 = vrot.slane %v1952_v53, 1  ;;  %v1992_v27 = vadd.f32 %v1991_v16, %v1990_v12  ;;  %v4099_v19 = vld [vmem:[#allocation3_spill] sm:$0xff]  ;;  %v4100_v16 = vld [vmem:[#allocation4_spill] sm:$0xff] }
 0x2be   : > { %v1954_v10 = vadd.f32 %v1953_v31, %v1952_v53  ;;  %v1993_v39 = vrot.slane %v1992_v27, 1 }
 0x2c0   : > { %1956 = vrot.lane.b32.xlu1 %v1954_v10, %s2818_s20  ;;  %v1994_v5 = vadd.f32 %v1993_v39, %v1992_v27  ;;  %v4101_v27 = vld [vmem:[#allocation5_spill] sm:$0xff]  ;;  %v4102_v39 = vld [vmem:[#allocation6_spill] sm:$0xff] }
 0x2c2   : > { %1996 = vrot.lane.b32.xlu0 %v1994_v5, %s2818_s20 }
 0x2f0   : > { %v1796_v34 = vpop.permute.xlu1 %1795 }
 0x2f1   : > { %v1798_v63 = vadd.f32 %v1796_v34, %v1720_v14 }
 0x2f2   : > { %v1836_v62 = vpop.permute.xlu0 %1835 }
 0x2f3   : > { %v1838_v49 = vadd.f32 %v1836_v62, %v1756_v29 }
 0x32c   : > { %v1876_v57 = vpop.permute.xlu1 %1875 }
 0x32d   : > { %v1878_v38 = vadd.f32 %v1876_v57, %v1798_v63 }
 0x32e   : > { %v1916_v18 = vpop.permute.xlu0 %1915 }
 0x32f   : > { %v1918_v13 = vadd.f32 %v1916_v18, %v1838_v49 }
 0x332   : > { %v1957_v26 = vpop.permute.xlu1 %1956 }
 0x333   : > { %v1959_v9 = vadd.f32 %v1957_v26, %v1878_v38 }
 0x334   : > { %v1997_v32 = vpop.permute.xlu0 %1996 }
 0x335   : > { %v2000_v47 = vmul.f32 0.00390625, %v1959_v9  ;;  %v1999_v4 = vadd.f32 %v1997_v32, %v1918_v13 }
 0x337   : > { %v2002_v2 = vmul.f32 %v2000_v47, %v2000_v47  ;;  %v2010_v48 = vrot.slane %v2000_v47, %v2009_v22  ;;  %v2001_v36 = vmul.f32 0.00390625, %v1999_v4 }
 0x339   : > { %v2011_v12 = vsub.f32 %v4098_v1, %v2010_v48  ;;  %v2012_v53 = vsub.f32 %v4099_v19, %v2010_v48  ;;  %v2013_v31 = vsub.f32 %v4100_v16, %v2010_v48  ;;  %v2014_v10 = vsub.f32 %v4101_v27, %v2010_v48  ;;  %2225 = vrot.lane.b32.xlu0 %v2010_v48, %s2827_s4 }
 0x33a   : > { %v2015_v5 = vsub.f32 %v4102_v39, %v2010_v48  ;;  %v2016_v45 = vsub.f32 %v4103_v23, %v2010_v48  ;;  %v2017_v35 = vsub.f32 %v4104_v6, %v2010_v48  ;;  %v2018_v46 = vsub.f32 %v4105_v60, %v2010_v48  ;;  %2056 = vrot.lane.b32.xlu1 %v2010_v48, %s2825_s29  ;;  %v4110_v23 = vld [vmem:[#allocation18_spill] sm:$0xff]  ;;  %v4111_v6 = vld [vmem:[#allocation17_spill] sm:$0xff] }
 0x33b   : > { %v2019_v28 = vsub.f32 %v4106_v24, %v2010_v48  ;;  %v2020_v50 = vsub.f32 %v4107_v56, %v2010_v48  ;;  %v2003_v55 = vsub.f32 %v2001_v36, %v2002_v2  ;;  %v4112_v56 = vld [vmem:[#allocation20_spill] sm:$0xff] }
 0x33d   : > { %v2004_v34 = vmax.f32 %v2003_v55, 0.0  ;;  %v4113_v55 = vld [vmem:[#allocation19_spill] sm:$0xff] }
 0x33f   : > { %v2005_v33 = vadd.f32 1e-05, %v2004_v34 }
 0x341   : > { %2788 = vrsqrt.f32 %v2005_v33 }
 0x34b   : > { %v2789_v3 = vpop.eup %2788 }
 0x34c   : > { %v2024_v62 = vrot.slane %v2789_v3, %v2009_v22 }
 0x34e   : > { %v2025_v14 = vmul.f32 %v2024_v62, %v2011_v12  ;;  %v2026_v57 = vmul.f32 %v2024_v62, %v2012_v53  ;;  %v2027_v63 = vmul.f32 %v2024_v62, %v2013_v31  ;;  %v2028_v29 = vmul.f32 %v2024_v62, %v2014_v10  ;;  %2238 = vrot.lane.b32.xlu0 %v2024_v62, %s2827_s4  ;;  %v4108_v53 = vld [vmem:[#allocation15_spill] sm:$0xff]  ;;  %v4109_v31 = vld [vmem:[#allocation16_spill] sm:$0xff] }
 0x34f   : > { %v2029_v11 = vmul.f32 %v2024_v62, %v2015_v5  ;;  %v2030_v18 = vmul.f32 %v2024_v62, %v2016_v45  ;;  %v2031_v49 = vmul.f32 %v2024_v62, %v2017_v35  ;;  %v2032_v38 = vmul.f32 %v2024_v62, %v2018_v46  ;;  %2070 = vrot.lane.b32.xlu1 %v2024_v62, %s2825_s29 }
 0x350   : > { %v2033_v26 = vmul.f32 %v2024_v62, %v2019_v28  ;;  %v2034_v13 = vmul.f32 %v2024_v62, %v2020_v50  ;;  %v2035_v22 = vmax.f32 %v2025_v14, 0.0  ;;  %v2036_v9 = vmax.f32 %v2026_v57, 0.0  ;;  %v4114_v57 = vld [vmem:[#allocation22_spill] sm:$0xff] }
 0x351   : > { %v2037_v32 = vmax.f32 %v2027_v63, 0.0  ;;  %v2038_v47 = vmax.f32 %v2028_v29, 0.0  ;;  %v2039_v4 = vmax.f32 %v2029_v11, 0.0  ;;  %v2040_v2 = vmax.f32 %v2030_v18, 0.0  ;;  %v4115_v29 = vld [vmem:[#allocation21_spill] sm:$0xff] }
 0x352   : > { %v2041_v48 = vmax.f32 %v2031_v49, 0.0  ;;  %v2042_v36 = vmax.f32 %v2032_v38, 0.0  ;;  %v2043_v1 = vmax.f32 %v2033_v26, 0.0  ;;  %v2044_v12 = vmax.f32 %v2034_v13, 0.0  ;;  %2045 = vst.msk [vmem:[%s3851_s8] sm:$0xff] %vm1695_vm3, %v2035_v22  ;;  %2046 = vst.msk [vmem:[%s3851_s8 + $0x8] sm:$0xff] %vm1695_vm3, %v2036_v9 }
 0x353   : > { %2047 = vst.msk [vmem:[%s3851_s8 + $0x10] sm:$0xff] %vm1695_vm3, %v2037_v32  ;;  %2048 = vst.msk [vmem:[%s3851_s8 + $0x18] sm:$0xff] %vm1695_vm3, %v2038_v47  ;;  %v4116_v22 = vld [vmem:[#allocation23_spill] sm:$0xff] }
 0x354   : > { %2049 = vst.msk [vmem:[%s3851_s8 + $0x20] sm:$0xff] %vm1695_vm3, %v2039_v4  ;;  %2050 = vst.msk [vmem:[%s3851_s8 + $0x28] sm:$0xff] %vm1695_vm3, %v2040_v2 }
 0x355   : > { %2051 = vst.msk [vmem:[%s3851_s8 + $0x30] sm:$0xff] %vm1695_vm3, %v2041_v48  ;;  %2052 = vst.msk [vmem:[%s3851_s8 + $0x38] sm:$0xff] %vm1695_vm3, %v2042_v36 }
 0x356   : > { %2053 = vst.msk [vmem:[%s3851_s8 + $0x40] sm:$0xff] %vm1695_vm3, %v2043_v1  ;;  %2054 = vst.msk [vmem:[%s3851_s8 + $0x48] sm:$0xff] %vm1695_vm3, %v2044_v12 }
 0x3ac   : > { %v3874_v19 = vpop.permute.xlu1 %2056 }
 0x3ad   : > { %v2060_v16 = vsub.f32 %v4108_v53, %v3874_v19  ;;  %v2059_v27 = vsub.f32 %v4109_v31, %v3874_v19  ;;  %v2062_v45 = vsub.f32 %v4110_v23, %v3874_v19  ;;  %v2061_v35 = vsub.f32 %v4111_v6, %v3874_v19 }
 0x3ae   : > { %v2064_v50 = vsub.f32 %v4112_v56, %v3874_v19  ;;  %v2063_v34 = vsub.f32 %v4113_v55, %v3874_v19  ;;  %v2066_v63 = vsub.f32 %v4114_v57, %v3874_v19  ;;  %v2065_v11 = vsub.f32 %v4115_v29, %v3874_v19 }
 0x3af   : > { %v2068_v13 = vsub.f32 %v3633_v58, %v3874_v19  ;;  %v2067_v9 = vsub.f32 %v4116_v22, %v3874_v19  ;;  %v2145_v48 = vsub.f32 %v3651_v51, %v3874_v19  ;;  %v2144_v36 = vsub.f32 %v3654_v44, %v3874_v19 }
 0x3b0   : > { %v2146_v31 = vsub.f32 %v3666_v21, %v3874_v19  ;;  %v2148_v23 = vsub.f32 %v3694_v7, %v3874_v19  ;;  %v2153_v56 = vsub.f32 %v3799_v59, %v3874_v19 }
 0x3c1   : > { %v3880_v10 = vpop.permute.xlu1 %2070 }
 0x3c2   : > { %v2074_v39 = vmul.f32 %v3880_v10, %v2060_v16  ;;  %v2073_v5 = vmul.f32 %v3880_v10, %v2059_v27  ;;  %v2076_v24 = vmul.f32 %v3880_v10, %v2062_v45  ;;  %v2075_v28 = vmul.f32 %v3880_v10, %v2061_v35 }
 0x3c3   : > { %v2078_v62 = vmul.f32 %v3880_v10, %v2064_v50  ;;  %v2077_v14 = vmul.f32 %v3880_v10, %v2063_v34  ;;  %v2080_v38 = vmul.f32 %v3880_v10, %v2066_v63  ;;  %v2079_v26 = vmul.f32 %v3880_v10, %v2065_v11 }
 0x3c4   : > { %v2084_v60 = vmax.f32 %v2074_v39, 0.0  ;;  %v2083_v46 = vmax.f32 %v2073_v5, 0.0  ;;  %v2086_v33 = vmax.f32 %v2076_v24, 0.0  ;;  %v2085_v3 = vmax.f32 %v2075_v28, 0.0  ;;  %v2226_v28 = vpop.permute.xlu0 %2225 }
 0x3c5   : > { %v2088_v18 = vmax.f32 %v2078_v62, 0.0  ;;  %v2087_v49 = vmax.f32 %v2077_v14, 0.0  ;;  %v2090_v32 = vmax.f32 %v2080_v38, 0.0  ;;  %v2089_v47 = vmax.f32 %v2079_v26, 0.0 }
 0x3c6   : > { %2105 = vrot.lane.b32.xlu0 %v2084_v60, %s2816_s18  ;;  %2103 = vrot.lane.b32.xlu1 %v2083_v46, %s2816_s18  ;;  %v2082_v4 = vmul.f32 %v3880_v10, %v2068_v13  ;;  %v2081_v2 = vmul.f32 %v3880_v10, %v2067_v9  ;;  %v2155_v12 = vmul.f32 %v2145_v48, %v3880_v10 }
 0x3c7   : > { %v2154_v53 = vmul.f32 %v2144_v36, %v3880_v10  ;;  %v2147_v16 = vsub.f32 %v3674_v41, %v3874_v19  ;;  %v2156_v39 = vmul.f32 %v2146_v31, %v3880_v10  ;;  %v2149_v5 = vsub.f32 %v3708_v52, %v3874_v19 }
 0x3c8   : > { %v2092_v58 = vmax.f32 %v2082_v4, 0.0  ;;  %v2091_v1 = vmax.f32 %v2081_v2, 0.0  ;;  %v2165_v51 = vmax.f32 %v2155_v12, 0.0  ;;  %v2158_v6 = vmul.f32 %v2148_v23, %v3880_v10 }
 0x3c9   : > { %v2164_v27 = vmax.f32 %v2154_v53, 0.0  ;;  %v2157_v44 = vmul.f32 %v2147_v16, %v3880_v10  ;;  %v2166_v45 = vmax.f32 %v2156_v39, 0.0  ;;  %v2159_v21 = vmul.f32 %v2149_v5, %v3880_v10 }
 0x3ca   : > { %2109 = vrot.lane.b32.xlu0 %v2086_v33, %s2816_s18  ;;  %2107 = vrot.lane.b32.xlu1 %v2085_v3, %s2816_s18  ;;  %v2151_v35 = vsub.f32 %v3742_v30, %v3874_v19  ;;  %v2150_v60 = vsub.f32 %v3732_v43, %v3874_v19  ;;  %v2168_v46 = vmax.f32 %v2158_v6, 0.0  ;;  %v2152_v30 = vsub.f32 %v3764_v15, %v3874_v19  ;;  %v2239_v33 = vpop.permute.xlu0 %2238 }
 0x3cb   : > { %v2167_v41 = vmax.f32 %v2157_v44, 0.0  ;;  %v2169_v52 = vmax.f32 %v2159_v21, 0.0  ;;  %v2163_v43 = vmul.f32 %v2153_v56, %v3880_v10  ;;  %v2229_v3 = vsub.f32 %v3677_v0, %v2226_v28 }
 0x3cc   : > { %v2161_v7 = vmul.f32 %v2151_v35, %v3880_v10  ;;  %v2160_v24 = vmul.f32 %v2150_v60, %v3880_v10  ;;  %v2162_v34 = vmul.f32 %v2152_v30, %v3880_v10  ;;  %v2228_v62 = vsub.f32 %v3668_v17, %v2226_v28 }
 0x3cd   : > { %v2173_v14 = vmax.f32 %v2163_v43, 0.0  ;;  %v2242_v57 = vmul.f32 %v2239_v33, %v2229_v3  ;;  %v2231_v15 = vsub.f32 %v3722_v54, %v2226_v28  ;;  %v2230_v19 = vsub.f32 %v3691_v25, %v2226_v28 }
 0x3ce   : > { %2113 = vrot.lane.b32.xlu0 %v2088_v18, %s2816_s18  ;;  %2111 = vrot.lane.b32.xlu1 %v2087_v49, %s2816_s18  ;;  %v2171_v50 = vmax.f32 %v2161_v7, 0.0  ;;  %v2170_v55 = vmax.f32 %v2160_v24, 0.0  ;;  %v2172_v59 = vmax.f32 %v2162_v34, 0.0  ;;  %v2241_v63 = vmul.f32 %v2239_v33, %v2228_v62 }
 0x3cf   : > { %v2252_v10 = vmax.f32 %v2242_v57, 0.0  ;;  %v2244_v11 = vmul.f32 %v2239_v33, %v2231_v15  ;;  %v2243_v18 = vmul.f32 %v2239_v33, %v2230_v19  ;;  %v2233_v17 = vsub.f32 %v3754_v8, %v2226_v28 }
 0x3d0   : > { %v2251_v29 = vmax.f32 %v2241_v63, 0.0  ;;  %v2232_v0 = vsub.f32 %v3737_v40, %v2226_v28  ;;  %v2235_v25 = vsub.f32 %v3776_v42, %v2226_v28  ;;  %v2234_v54 = vsub.f32 %v3766_v37, %v2226_v28 }
 0x3d1   : > { %v2254_v49 = vmax.f32 %v2244_v11, 0.0  ;;  %v2253_v38 = vmax.f32 %v2243_v18, 0.0  ;;  %v2246_v26 = vmul.f32 %v2239_v33, %v2233_v17  ;;  %v2237_v40 = vsub.f32 %v3797_v61, %v2226_v28 }
 0x3d2   : > { %2117 = vrot.lane.b32.xlu0 %v2090_v32, %s2816_s18  ;;  %2115 = vrot.lane.b32.xlu1 %v2089_v47, %s2816_s18  ;;  %v2245_v13 = vmul.f32 %v2239_v33, %v2232_v0  ;;  %v2248_v32 = vmul.f32 %v2239_v33, %v2235_v25  ;;  %v2247_v47 = vmul.f32 %v2239_v33, %v2234_v54 }
 0x3d3   : > { %v2256_v22 = vmax.f32 %v2246_v26, 0.0  ;;  %v2236_v8 = vsub.f32 %v3813_v20, %v2226_v28  ;;  %v2250_v42 = vmul.f32 %v2239_v33, %v2237_v40 }
 0x3d4   : > { %v2255_v9 = vmax.f32 %v2245_v13, 0.0  ;;  %v2258_v4 = vmax.f32 %v2248_v32, 0.0  ;;  %v2257_v2 = vmax.f32 %v2247_v47, 0.0 }
 0x3d5   : > { %v2249_v37 = vmul.f32 %v2239_v33, %v2236_v8  ;;  %v2260_v48 = vmax.f32 %v2250_v42, 0.0 }
 0x3d6   : > { %2121 = vrot.lane.b32.xlu0 %v2092_v58, %s2816_s18  ;;  %2119 = vrot.lane.b32.xlu1 %v2091_v1, %s2816_s18 }
 0x3d7   : > { %v2259_v36 = vmax.f32 %v2249_v37, 0.0 }
 0x3da   : > { %2186 = vrot.lane.b32.xlu0 %v2165_v51, %s2816_s18  ;;  %2184 = vrot.lane.b32.xlu1 %v2164_v27, %s2816_s18 }
 0x3de   : > { %2190 = vrot.lane.b32.xlu0 %v2167_v41, %s2816_s18  ;;  %2188 = vrot.lane.b32.xlu1 %v2166_v45, %s2816_s18 }
 0x3e2   : > { %2194 = vrot.lane.b32.xlu0 %v2169_v52, %s2816_s18  ;;  %2192 = vrot.lane.b32.xlu1 %v2168_v46, %s2816_s18 }
 0x3e6   : > { %2198 = vrot.lane.b32.xlu0 %v2171_v50, %s2816_s18  ;;  %2196 = vrot.lane.b32.xlu1 %v2170_v55, %s2816_s18 }
 0x3ea   : > { %2202 = vrot.lane.b32.xlu0 %v2173_v14, %s2816_s18  ;;  %2200 = vrot.lane.b32.xlu1 %v2172_v59, %s2816_s18 }
 0x3ee   : > { %2273 = vrot.lane.b32.xlu0 %v2252_v10, %s2818_s20  ;;  %2271 = vrot.lane.b32.xlu1 %v2251_v29, %s2818_s20 }
 0x3f2   : > { %2277 = vrot.lane.b32.xlu0 %v2254_v49, %s2818_s20  ;;  %2275 = vrot.lane.b32.xlu1 %v2253_v38, %s2818_s20 }
 0x3f6   : > { %2281 = vrot.lane.b32.xlu0 %v2256_v22, %s2818_s20  ;;  %2279 = vrot.lane.b32.xlu1 %v2255_v9, %s2818_s20 }
 0x3fa   : > { %2285 = vrot.lane.b32.xlu0 %v2258_v4, %s2818_s20  ;;  %2283 = vrot.lane.b32.xlu1 %v2257_v2, %s2818_s20 }
 0x3fe   : > { %2289 = vrot.lane.b32.xlu0 %v2260_v48, %s2818_s20  ;;  %2287 = vrot.lane.b32.xlu1 %v2259_v36, %s2818_s20 }
 0x438   : > { %v2106_v61 = vpop.permute.xlu0 %2105  ;;  %v2104_v20 = vpop.permute.xlu1 %2103 }
 0x439   : > { %2460 = vst.msk [vmem:[%s3851_s8 + $0x58] sm:$0xff] %vm1695_vm3, %v2106_v61  ;;  %2459 = vst.msk [vmem:[%s3851_s8 + $0x50] sm:$0xff] %vm1695_vm3, %v2104_v20 }
 0x43c   : > { %v2110_v58 = vpop.permute.xlu0 %2109  ;;  %v2108_v1 = vpop.permute.xlu1 %2107 }
 0x43d   : > { %2462 = vst.msk [vmem:[%s3851_s8 + $0x68] sm:$0xff] %vm1695_vm3, %v2110_v58  ;;  %2461 = vst.msk [vmem:[%s3851_s8 + $0x60] sm:$0xff] %vm1695_vm3, %v2108_v1 }
 0x440   : > { %v2114_v12 = vpop.permute.xlu0 %2113  ;;  %v2112_v53 = vpop.permute.xlu1 %2111 }
 0x441   : > { %2464 = vst.msk [vmem:[%s3851_s8 + $0x78] sm:$0xff] %vm1695_vm3, %v2114_v12  ;;  %2463 = vst.msk [vmem:[%s3851_s8 + $0x70] sm:$0xff] %vm1695_vm3, %v2112_v53 }
 0x444   : > { %v2118_v16 = vpop.permute.xlu0 %2117  ;;  %v2116_v31 = vpop.permute.xlu1 %2115 }
 0x445   : > { %2466 = vst.msk [vmem:[%s3851_s8 + $0x88] sm:$0xff] %vm1695_vm3, %v2118_v16  ;;  %2465 = vst.msk [vmem:[%s3851_s8 + $0x80] sm:$0xff] %vm1695_vm3, %v2116_v31 }
 0x448   : > { %v2122_v51 = vpop.permute.xlu0 %2121  ;;  %v2120_v27 = vpop.permute.xlu1 %2119 }
 0x449   : > { %2468 = vst.msk [vmem:[%s3851_s8 + $0x98] sm:$0xff] %vm1695_vm3, %v2122_v51  ;;  %2467 = vst.msk [vmem:[%s3851_s8 + $0x90] sm:$0xff] %vm1695_vm3, %v2120_v27 }
 0x44c   : > { %v2187_v44 = vpop.permute.xlu0 %2186  ;;  %v2185_v39 = vpop.permute.xlu1 %2184 }
 0x44d   : > { %2470 = vst.msk [vmem:[%s3851_s8 + $0xa8] sm:$0xff] %vm1695_vm3, %v2187_v44  ;;  %2469 = vst.msk [vmem:[%s3851_s8 + $0xa0] sm:$0xff] %vm1695_vm3, %v2185_v39 }
 0x450   : > { %v2191_v5 = vpop.permute.xlu0 %2190  ;;  %v2189_v23 = vpop.permute.xlu1 %2188 }
 0x451   : > { %2472 = vst.msk [vmem:[%s3851_s8 + $0xb8] sm:$0xff] %vm1695_vm3, %v2191_v5  ;;  %2471 = vst.msk [vmem:[%s3851_s8 + $0xb0] sm:$0xff] %vm1695_vm3, %v2189_v23 }
 0x454   : > { %v2195_v41 = vpop.permute.xlu0 %2194  ;;  %v2193_v45 = vpop.permute.xlu1 %2192 }
 0x455   : > { %2474 = vst.msk [vmem:[%s3851_s8 + $0xc8] sm:$0xff] %vm1695_vm3, %v2195_v41  ;;  %2473 = vst.msk [vmem:[%s3851_s8 + $0xc0] sm:$0xff] %vm1695_vm3, %v2193_v45 }
 0x458   : > { %v2199_v21 = vpop.permute.xlu0 %2198  ;;  %v2197_v6 = vpop.permute.xlu1 %2196 }
 0x459   : > { %2476 = vst.msk [vmem:[%s3851_s8 + $0xd8] sm:$0xff] %vm1695_vm3, %v2199_v21  ;;  %2475 = vst.msk [vmem:[%s3851_s8 + $0xd0] sm:$0xff] %vm1695_vm3, %v2197_v6 }
 0x45c   : > { %v2203_v35 = vpop.permute.xlu0 %2202  ;;  %v2201_v60 = vpop.permute.xlu1 %2200 }
 0x45d   : > { %2478 = vst.msk [vmem:[%s3851_s8 + $0xe8] sm:$0xff] %vm1695_vm3, %v2203_v35  ;;  %2477 = vst.msk [vmem:[%s3851_s8 + $0xe0] sm:$0xff] %vm1695_vm3, %v2201_v60 }
 0x460   : > { %v2274_v52 = vpop.permute.xlu0 %2273  ;;  %v2272_v46 = vpop.permute.xlu1 %2271 }
 0x461   : > { %2480 = vst.msk [vmem:[%s3851_s8 + $0xf8] sm:$0xff] %vm1695_vm3, %v2274_v52  ;;  %2479 = vst.msk [vmem:[%s3851_s8 + $0xf0] sm:$0xff] %vm1695_vm3, %v2272_v46 }
 0x464   : > { %v2278_v7 = vpop.permute.xlu0 %2277  ;;  %v2276_v24 = vpop.permute.xlu1 %2275 }
 0x465   : > { %2482 = vst.msk [vmem:[%s3851_s8 + $0x108] sm:$0xff] %vm1695_vm3, %v2278_v7  ;;  %2481 = vst.msk [vmem:[%s3851_s8 + $0x100] sm:$0xff] %vm1695_vm3, %v2276_v24 }
 0x468   : > { %v2282_v28 = vpop.permute.xlu0 %2281  ;;  %v2280_v56 = vpop.permute.xlu1 %2279 }
 0x469   : > { %2484 = vst.msk [vmem:[%s3851_s8 + $0x118] sm:$0xff] %vm1695_vm3, %v2282_v28  ;;  %2483 = vst.msk [vmem:[%s3851_s8 + $0x110] sm:$0xff] %vm1695_vm3, %v2280_v56 }
 0x46c   : > { %v2286_v30 = vpop.permute.xlu0 %2285  ;;  %v2284_v50 = vpop.permute.xlu1 %2283 }
 0x46d   : > { %2486 = vst.msk [vmem:[%s3851_s8 + $0x128] sm:$0xff] %vm1695_vm3, %v2286_v30  ;;  %2485 = vst.msk [vmem:[%s3851_s8 + $0x120] sm:$0xff] %vm1695_vm3, %v2284_v50 }
 0x470   : > { %v2290_v55 = vpop.permute.xlu0 %2289  ;;  %v2288_v43 = vpop.permute.xlu1 %2287 }
 0x471   : > { %2488 = vst.msk [vmem:[%s3851_s8 + $0x138] sm:$0xff] %vm1695_vm3, %v2290_v55  ;;  %2487 = vst.msk [vmem:[%s3851_s8 + $0x130] sm:$0xff] %vm1695_vm3, %v2288_v43 }
 0x472 PF: > { %s13_s14 = sadd.s32 1, %s2812_s14   ;;  %s4117_s12 = smov %s2808_s13 }
 0x473   : > { %p10_p5 = scmp.ge.s32.totalorder %s13_s14, 4   ;;  %s4118_s13 = smov %s4120_s15 }
 0x475   :  { %12 = sbr.rel (!%p10_p5) target bundleno = 2 (0x2), region = 68 }

</bundles_post_ra>
